<compile_context>
chip_gen: v7x
topology: tpu7x:2x2x1
jax: 0.10.0
libtpu: 0.0.40
codegen_flags: <defaults>
</compile_context>

<pallas_src>
import functools

import jax
import jax.numpy as jnp
from jax.experimental import pallas as pl
from jax.experimental.pallas import tpu as pltpu

EPS = 1e-5
_VMEM_LIMIT = 32 * 1024 * 1024  # sized for v7x's 64 MiB/TC with ample headroom


def _round_up(x, m):
    return (x + m - 1) // m * m


# ---------------------------------------------------------------------------
# Pallas kernels
# ---------------------------------------------------------------------------
def _conv_stats_kernel(w_ref, p_ref, y_ref, s_ref, sq_ref):
    """One M-tile of the folded 3x3 conv + BN partial statistics.

    w:  (C, 9C)  bf16, resident across the grid (same block every step)
    p:  (9C, TM) bf16 im2col tile (taps folded into K)
    y:  (C, TM)  f32 pre-BN conv output tile (lane-dense)
    s, sq: (1, C, 1) per-tile per-channel sum / sum-of-squares partials
    """
    y = jnp.dot(w_ref[...], p_ref[...], preferred_element_type=jnp.float32)
    y_ref[...] = y
    s_ref[...] = jnp.sum(y, axis=1, keepdims=True).reshape(s_ref.shape)
    sq_ref[...] = jnp.sum(y * y, axis=1, keepdims=True).reshape(sq_ref.shape)


def _bn_kernel(scale_ref, shift_ref, y_ref, o_ref):
    o_ref[...] = (y_ref[...] * scale_ref[...] + shift_ref[...]).astype(o_ref.dtype)


def _bn_add_kernel(scale_ref, shift_ref, y_ref, r_ref, o_ref):
    o_ref[...] = (y_ref[...] * scale_ref[...] + shift_ref[...]
                  + r_ref[...]).astype(o_ref.dtype)


# ---------------------------------------------------------------------------
# Conv + BN wrapper (Pallas, tiled over M)
# ---------------------------------------------------------------------------
def _conv_out_hw(H, W, stride, padding, dilation):
    Ho = (H + 2 * padding - 2 * dilation - 1) // stride + 1
    Wo = (W + 2 * padding - 2 * dilation - 1) // stride + 1
    return Ho, Wo


def conv3x3_bn(x, w_hwio, gamma, beta, *, stride, padding, dilation,
               residual=None, tile_m=512):
    """3x3 conv (no bias) + BatchNorm (batch stats) (+ optional post-BN add).

    x:        (C, N, H, W) f32 channel-major activations
    w_hwio:   (3, 3, Cin, Cout)
    gamma, beta: (C, 1)
    residual: optional (C, N, Ho, Wo) added AFTER the BN (e.g. conv1(x)+up(h1)).
    """
    C, N, H, W = x.shape
    Ho, Wo = _conv_out_hw(H, W, stride, padding, dilation)
    M = N * Ho * Wo

    # --- im2col (plain-JAX glue, taps folded into K), cast to bf16 ----------
    # TODO(synk): for very large activations this still materializes a 9x
    # duplicated patch slab in HBM; a halo-tiled in-kernel tap gather would
    # remove that traffic.
    xp = jnp.pad(x, ((0, 0), (0, 0), (padding, padding), (padding, padding)))
    taps = []
    for kh in range(3):
        for kw in range(3):
            h0 = kh * dilation
            w0 = kw * dilation
            sl = xp[:, :, h0:h0 + (Ho - 1) * stride + 1:stride,
                          w0:w0 + (Wo - 1) * stride + 1:stride]
            taps.append(sl.reshape(C, M))
    patches = jnp.concatenate(taps, axis=0).astype(jnp.bfloat16)      # (9C, M)

    tm = min(tile_m, _round_up(M, 128))
    m_pad = _round_up(M, tm)
    if m_pad != M:
        patches = jnp.pad(patches, ((0, 0), (0, m_pad - M)))
    nt = m_pad // tm

    # (kh, kw, Cin, Cout) -> (Cout, 9*Cin), matching tap-major patch ordering.
    w2 = jnp.transpose(w_hwio, (3, 0, 1, 2)).reshape(C, 9 * C).astype(jnp.bfloat16)

    cparams = pltpu.CompilerParams(dimension_semantics=("parallel",),
                                   vmem_limit_bytes=_VMEM_LIMIT)

    y, s_part, sq_part = pl.pallas_call(
        _conv_stats_kernel,
        grid=(nt,),
        in_specs=[pl.BlockSpec((C, 9 * C), lambda i: (0, 0)),
                  pl.BlockSpec((9 * C, tm), lambda i: (0, i))],
        out_specs=[pl.BlockSpec((C, tm), lambda i: (0, i)),
                   pl.BlockSpec((1, C, 1), lambda i: (i, 0, 0)),
                   pl.BlockSpec((1, C, 1), lambda i: (i, 0, 0))],
        out_shape=[jax.ShapeDtypeStruct((C, m_pad), jnp.float32),
                   jax.ShapeDtypeStruct((nt, C, 1), jnp.float32),
                   jax.ShapeDtypeStruct((nt, C, 1), jnp.float32)],
        compiler_params=cparams,
    )(w2, patches)

    # --- BN scale/shift from full-M statistics (tiny per-channel math) ------
    # Padded lanes are exactly zero, so they do not perturb sum / sumsq.
    s = jnp.sum(s_part, axis=0)                       # (C, 1)
    sq = jnp.sum(sq_part, axis=0)                     # (C, 1)
    mean = s / M
    var = jnp.maximum(sq / M - mean * mean, 0.0)      # biased var (torch training BN)
    scale = gamma * jax.lax.rsqrt(var + EPS)
    shift = beta - mean * scale

    # --- finalize: normalize (+ fused post-BN residual add) -----------------
    if residual is None:
        out = pl.pallas_call(
            _bn_kernel,
            grid=(nt,),
            in_specs=[pl.BlockSpec((C, 1), lambda i: (0, 0)),
                      pl.BlockSpec((C, 1), lambda i: (0, 0)),
                      pl.BlockSpec((C, tm), lambda i: (0, i))],
            out_specs=pl.BlockSpec((C, tm), lambda i: (0, i)),
            out_shape=jax.ShapeDtypeStruct((C, m_pad), jnp.float32),
            compiler_params=cparams,
        )(scale, shift, y)
    else:
        r = residual.reshape(C, M)
        if m_pad != M:
            r = jnp.pad(r, ((0, 0), (0, m_pad - M)))
        out = pl.pallas_call(
            _bn_add_kernel,
            grid=(nt,),
            in_specs=[pl.BlockSpec((C, 1), lambda i: (0, 0)),
                      pl.BlockSpec((C, 1), lambda i: (0, 0)),
                      pl.BlockSpec((C, tm), lambda i: (0, i)),
                      pl.BlockSpec((C, tm), lambda i: (0, i))],
            out_specs=pl.BlockSpec((C, tm), lambda i: (0, i)),
            out_shape=jax.ShapeDtypeStruct((C, m_pad), jnp.float32),
            compiler_params=cparams,
        )(scale, shift, y, r)

    return out[:, :M].reshape(C, N, Ho, Wo)


# ---------------------------------------------------------------------------
# Bilinear (align_corners=True) interpolation — plain-JAX glue.
# ---------------------------------------------------------------------------
def _interp_matrix(out_size, in_size):
    if in_size == 1:
        return jnp.ones((out_size, 1), jnp.float32)
    if out_size == 1:
        return jnp.zeros((1, in_size), jnp.float32).at[0, 0].set(1.0)
    src = jnp.arange(out_size, dtype=jnp.float32) * ((in_size - 1) / (out_size - 1))
    i0 = jnp.clip(jnp.floor(src).astype(jnp.int32), 0, in_size - 1)
    i1 = jnp.minimum(i0 + 1, in_size - 1)
    frac = src - i0.astype(jnp.float32)
    oh0 = jax.nn.one_hot(i0, in_size, dtype=jnp.float32)
    oh1 = jax.nn.one_hot(i1, in_size, dtype=jnp.float32)
    return oh0 * (1.0 - frac)[:, None] + oh1 * frac[:, None]


def bilinear_align_corners(x, out_hw):
    """F.interpolate(..., mode='bilinear', align_corners=True) on (C,N,H,W)."""
    # TODO(synk): kept as a plain-JAX separable interpolation-matrix einsum; it
    # is not the hot path and XLA fuses it into the im2col / residual producers.
    C, N, H, W = x.shape
    Ho, Wo = out_hw
    if (Ho, Wo) == (H, W):
        return x  # align_corners=True at identical size is the identity
    Mh = _interp_matrix(Ho, H)
    Mw = _interp_matrix(Wo, W)
    return jnp.einsum('ih,jw,cnhw->cnij', Mh, Mw, x)


# ---------------------------------------------------------------------------
# Parameters & USRM4 forward
# ---------------------------------------------------------------------------
_CONV_NAMES = ('conv1', 'conv2', 'conv3', 'conv4',
               'conv_rev1', 'conv_rev2', 'conv_rev3',
               'conv_sum1', 'conv_sum2')

# (stride, padding, dilation) per BasicConv, as in USRM4.__init__
_CONV_CFG = {
    'conv1': (1, 2, 2), 'conv2': (2, 1, 1), 'conv3': (2, 1, 1), 'conv4': (1, 2, 2),
    'conv_rev1': (1, 1, 1), 'conv_rev2': (1, 1, 1), 'conv_rev3': (1, 1, 1),
    'conv_sum1': (1, 1, 1), 'conv_sum2': (1, 1, 1),
}


def init_params(channel, key):
    params = {}
    keys = jax.random.split(key, len(_CONV_NAMES))
    for name, k in zip(_CONV_NAMES, keys):
        params[name] = dict(
            w=jax.random.normal(k, (3, 3, channel, channel), jnp.float32) * 0.1,
            gamma=jnp.ones((channel, 1), jnp.float32),   # BN weight default
            beta=jnp.zeros((channel, 1), jnp.float32),   # BN bias default
        )
    return params


def usrm4_forward(params, x_nchw, h1_nchw):
    # NCHW (PyTorch) -> channel-major (C, N, H, W) used by the kernels.
    x = jnp.transpose(x_nchw, (1, 0, 2, 3))
    h1 = jnp.transpose(h1_nchw, (1, 0, 2, 3))

    def cb(name, inp, residual=None):
        s, p, d = _CONV_CFG[name]
        prm = params[name]
        return conv3x3_bn(inp, prm['w'], prm['gamma'], prm['beta'],
                          stride=s, padding=p, dilation=d, residual=residual)

    # conv1's post-BN residual (h1 resized to conv1's output) fused into the
    # BN-finalize kernel.
    s1, p1, d1 = _CONV_CFG['conv1']
    y1_hw = _conv_out_hw(x.shape[2], x.shape[3], s1, p1, d1)
    y1 = cb('conv1', x, residual=bilinear_align_corners(h1, y1_hw))

    y2 = cb('conv2', y1)
    y3 = cb('conv3', y2)
    y4 = cb('conv4', y3)

    # Pre-conv adds / ReLUs are folded into the (XLA-fused) patch producers.
    y3up = bilinear_align_corners(y4, y3.shape[2:])
    y3 = cb('conv_rev1', y3 + y3up)
    y2up = bilinear_align_corners(y3, y2.shape[2:])
    y2 = cb('conv_rev2', y2 + y2up)
    y1up = bilinear_align_corners(y2, y1.shape[2:])
    y1 = cb('conv_rev3', y1 + y1up)

    y = bilinear_align_corners(y1, x.shape[2:])
    out1 = cb('conv_sum1', jnp.maximum(x + y, 0.0))
    out2 = cb('conv_sum2',
              jnp.maximum(h1 + bilinear_align_corners(y1up, h1.shape[2:]), 0.0))

    # channel-major -> NCHW
    return (jnp.transpose(out1, (1, 0, 2, 3)),
            jnp.transpose(out2, (1, 0, 2, 3)))


if __name__ == "__main__":
    key = jax.random.PRNGKey(0)
    kx, kh, kp = jax.random.split(key, 3)

    # Decoder in BINet uses channel=64; keep spatial small.
    N, C, H, W = 2, 64, 16, 16         # x:  (N, C, 16, 16)  NCHW
    Hh, Wh = 8, 8                      # h1: (N, C, 8, 8)    NCHW

    x = jax.random.normal(kx, (N, C, H, W), jnp.float32)
    h1 = jax.random.normal(kh, (N, C, Hh, Wh), jnp.float32)
    params = init_params(C, kp)

    fwd = jax.jit(usrm4_forward)
    out1, out2 = fwd(params, x, h1)
    jax.block_until_ready((out1, out2))

    assert out1.shape == (N, C, H, W)
    assert out2.shape == (N, C, Hh, Wh)
    print("KERNEL_OK")
</pallas_src>

<mosaic_0001>
module attributes {stable_mosaic.version = 11 : i64} {
  func.func @_conv_stats_kernel(%arg0: i32, %arg1: memref<64x576xbf16, #tpu.memory_space<vmem>>, %arg2: memref<576x512xbf16, #tpu.memory_space<vmem>>, %arg3: memref<64x512xf32, #tpu.memory_space<vmem>>, %arg4: memref<1x64x1xf32, #tpu.memory_space<vmem>>, %arg5: memref<1x64x1xf32, #tpu.memory_space<vmem>>) attributes {dimension_semantics = [#tpu.dimension_semantics<parallel>], iteration_bounds = array<i64: 1>, scalar_prefetch = 0 : i64, scratch_operands = 0 : i64, tpu.core_type = #tpu.core_type<tc>, window_params = [{pipeline_mode = #tpu.pipeline_mode<synchronous>, transform_indices = @transform_0, window_bounds = array<i64: 64, 576>}, {transform_indices = @transform_1, window_bounds = array<i64: 576, 512>}, {transform_indices = @transform_2, window_bounds = array<i64: 64, 512>}, {transform_indices = @transform_3, window_bounds = array<i64: 1, 64, 1>}, {transform_indices = @transform_4, window_bounds = array<i64: 1, 64, 1>}]} {
    %c0 = arith.constant 0 : index
    %c0_0 = arith.constant 0 : index
    %0 = vector.load %arg1[%c0, %c0_0] : memref<64x576xbf16, #tpu.memory_space<vmem>>, vector<64x576xbf16>
    %c0_1 = arith.constant 0 : index
    %c0_2 = arith.constant 0 : index
    %1 = vector.load %arg2[%c0_1, %c0_2] : memref<576x512xbf16, #tpu.memory_space<vmem>>, vector<576x512xbf16>
    %cst = arith.constant dense<0.000000e+00> : vector<64x512xf32>
    %2 = tpu.matmul %0, %1, %cst {dimension_numbers = #tpu.dot_dimension_numbers<[1], [0], [0], [1], [0, 0, 1, 1], [], []>} : vector<64x576xbf16>, vector<576x512xbf16>, vector<64x512xf32> -> vector<64x512xf32>
    %c0_3 = arith.constant 0 : index
    %c0_4 = arith.constant 0 : index
    %3 = vector.load %arg3[%c0_3, %c0_4] : memref<64x512xf32, #tpu.memory_space<vmem>>, vector<64x512xf32>
    tpu.vector_store %arg3[%c0_3, %c0_4], %2 {strides = array<i32>} : memref<64x512xf32, #tpu.memory_space<vmem>>, vector<64x512xf32>,
    %cst_5 = arith.constant dense<0.000000e+00> : vector<64xf32>
    %4 = vector.multi_reduction <add>, %2, %cst_5 [1] : vector<64x512xf32> to vector<64xf32>
    %5 = vector.shape_cast %4 : vector<64xf32> to vector<64x1xf32>
    %6 = vector.shape_cast %5 : vector<64x1xf32> to vector<1x64x1xf32>
    %c0_6 = arith.constant 0 : index
    %c0_7 = arith.constant 0 : index
    %c0_8 = arith.constant 0 : index
    %7 = vector.load %arg4[%c0_6, %c0_7, %c0_8] : memref<1x64x1xf32, #tpu.memory_space<vmem>>, vector<1x64x1xf32>
    tpu.vector_store %arg4[%c0_6, %c0_7, %c0_8], %6 {strides = array<i32>} : memref<1x64x1xf32, #tpu.memory_space<vmem>>, vector<1x64x1xf32>,
    %8 = arith.mulf %2, %2 : vector<64x512xf32>
    %cst_9 = arith.constant dense<0.000000e+00> : vector<64xf32>
    %9 = vector.multi_reduction <add>, %8, %cst_9 [1] : vector<64x512xf32> to vector<64xf32>
    %10 = vector.shape_cast %9 : vector<64xf32> to vector<64x1xf32>
    %11 = vector.shape_cast %10 : vector<64x1xf32> to vector<1x64x1xf32>
    %c0_10 = arith.constant 0 : index
    %c0_11 = arith.constant 0 : index
    %c0_12 = arith.constant 0 : index
    %12 = vector.load %arg5[%c0_10, %c0_11, %c0_12] : memref<1x64x1xf32, #tpu.memory_space<vmem>>, vector<1x64x1xf32>
    tpu.vector_store %arg5[%c0_10, %c0_11, %c0_12], %11 {strides = array<i32>} : memref<1x64x1xf32, #tpu.memory_space<vmem>>, vector<1x64x1xf32>,
    return
  }
  func.func @transform_0(%arg0: i32) -> (i32, i32) {
    %c0_i32 = arith.constant 0 : i32
    %c0_i32_0 = arith.constant 0 : i32
    %c0_i32_1 = arith.constant 0 : i32
    return %c0_i32, %c0_i32_0 : i32, i32
  }
  func.func @transform_1(%arg0: i32) -> (i32, i32) {
    %c0_i32 = arith.constant 0 : i32
    %c0_i32_0 = arith.constant 0 : i32
    return %c0_i32, %arg0 : i32, i32
  }
  func.func @transform_2(%arg0: i32) -> (i32, i32) {
    %c0_i32 = arith.constant 0 : i32
    %c0_i32_0 = arith.constant 0 : i32
    return %c0_i32, %arg0 : i32, i32
  }
  func.func @transform_3(%arg0: i32) -> (i32, i32, i32) {
    %c0_i32 = arith.constant 0 : i32
    %c0_i32_0 = arith.constant 0 : i32
    %c0_i32_1 = arith.constant 0 : i32
    return %arg0, %c0_i32, %c0_i32_0 : i32, i32, i32
  }
  func.func @transform_4(%arg0: i32) -> (i32, i32, i32) {
    %c0_i32 = arith.constant 0 : i32
    %c0_i32_0 = arith.constant 0 : i32
    %c0_i32_1 = arith.constant 0 : i32
    return %arg0, %c0_i32, %c0_i32_0 : i32, i32, i32
  }
}

module attributes {stable_mosaic.version = 11 : i64} {
  func.func @_bn_add_kernel(%arg0: i32, %arg1: memref<64x1xf32, #tpu.memory_space<vmem>>, %arg2: memref<64x1xf32, #tpu.memory_space<vmem>>, %arg3: memref<64x512xf32, #tpu.memory_space<vmem>>, %arg4: memref<64x512xf32, #tpu.memory_space<vmem>>, %arg5: memref<64x512xf32, #tpu.memory_space<vmem>>) attributes {dimension_semantics = [#tpu.dimension_semantics<parallel>], iteration_bounds = array<i64: 1>, scalar_prefetch = 0 : i64, scratch_operands = 0 : i64, tpu.core_type = #tpu.core_type<tc>, window_params = [{pipeline_mode = #tpu.pipeline_mode<synchronous>, transform_indices = @transform_0, window_bounds = array<i64: 64, 1>}, {pipeline_mode = #tpu.pipeline_mode<synchronous>, transform_indices = @transform_1, window_bounds = array<i64: 64, 1>}, {transform_indices = @transform_2, window_bounds = array<i64: 64, 512>}, {transform_indices = @transform_3, window_bounds = array<i64: 64, 512>}, {transform_indices = @transform_4, window_bounds = array<i64: 64, 512>}]} {
    %c0 = arith.constant 0 : index
    %c0_0 = arith.constant 0 : index
    %0 = vector.load %arg3[%c0, %c0_0] : memref<64x512xf32, #tpu.memory_space<vmem>>, vector<64x512xf32>
    %c0_1 = arith.constant 0 : index
    %c0_2 = arith.constant 0 : index
    %1 = vector.load %arg1[%c0_1, %c0_2] : memref<64x1xf32, #tpu.memory_space<vmem>>, vector<64x1xf32>
    %2 = vector.broadcast %1 : vector<64x1xf32> to vector<64x512xf32>
    %3 = arith.mulf %0, %2 : vector<64x512xf32>
    %c0_3 = arith.constant 0 : index
    %c0_4 = arith.constant 0 : index
    %4 = vector.load %arg2[%c0_3, %c0_4] : memref<64x1xf32, #tpu.memory_space<vmem>>, vector<64x1xf32>
    %5 = vector.broadcast %4 : vector<64x1xf32> to vector<64x512xf32>
    %6 = arith.addf %3, %5 : vector<64x512xf32>
    %c0_5 = arith.constant 0 : index
    %c0_6 = arith.constant 0 : index
    %7 = vector.load %arg4[%c0_5, %c0_6] : memref<64x512xf32, #tpu.memory_space<vmem>>, vector<64x512xf32>
    %8 = arith.addf %6, %7 : vector<64x512xf32>
    %c0_7 = arith.constant 0 : index
    %c0_8 = arith.constant 0 : index
    %9 = vector.load %arg5[%c0_7, %c0_8] : memref<64x512xf32, #tpu.memory_space<vmem>>, vector<64x512xf32>
    tpu.vector_store %arg5[%c0_7, %c0_8], %8 {strides = array<i32>} : memref<64x512xf32, #tpu.memory_space<vmem>>, vector<64x512xf32>,
    return
  }
  func.func @transform_0(%arg0: i32) -> (i32, i32) {
    %c0_i32 = arith.constant 0 : i32
    %c0_i32_0 = arith.constant 0 : i32
    %c0_i32_1 = arith.constant 0 : i32
    return %c0_i32, %c0_i32_0 : i32, i32
  }
  func.func @transform_1(%arg0: i32) -> (i32, i32) {
    %c0_i32 = arith.constant 0 : i32
    %c0_i32_0 = arith.constant 0 : i32
    %c0_i32_1 = arith.constant 0 : i32
    return %c0_i32, %c0_i32_0 : i32, i32
  }
  func.func @transform_2(%arg0: i32) -> (i32, i32) {
    %c0_i32 = arith.constant 0 : i32
    %c0_i32_0 = arith.constant 0 : i32
    return %c0_i32, %arg0 : i32, i32
  }
  func.func @transform_3(%arg0: i32) -> (i32, i32) {
    %c0_i32 = arith.constant 0 : i32
    %c0_i32_0 = arith.constant 0 : i32
    return %c0_i32, %arg0 : i32, i32
  }
  func.func @transform_4(%arg0: i32) -> (i32, i32) {
    %c0_i32 = arith.constant 0 : i32
    %c0_i32_0 = arith.constant 0 : i32
    return %c0_i32, %arg0 : i32, i32
  }
}

module attributes {stable_mosaic.version = 11 : i64} {
  func.func @_conv_stats_kernel(%arg0: i32, %arg1: memref<64x576xbf16, #tpu.memory_space<vmem>>, %arg2: memref<576x128xbf16, #tpu.memory_space<vmem>>, %arg3: memref<64x128xf32, #tpu.memory_space<vmem>>, %arg4: memref<1x64x1xf32, #tpu.memory_space<vmem>>, %arg5: memref<1x64x1xf32, #tpu.memory_space<vmem>>) attributes {dimension_semantics = [#tpu.dimension_semantics<parallel>], iteration_bounds = array<i64: 1>, scalar_prefetch = 0 : i64, scratch_operands = 0 : i64, tpu.core_type = #tpu.core_type<tc>, window_params = [{pipeline_mode = #tpu.pipeline_mode<synchronous>, transform_indices = @transform_0, window_bounds = array<i64: 64, 576>}, {transform_indices = @transform_1, window_bounds = array<i64: 576, 128>}, {transform_indices = @transform_2, window_bounds = array<i64: 64, 128>}, {transform_indices = @transform_3, window_bounds = array<i64: 1, 64, 1>}, {transform_indices = @transform_4, window_bounds = array<i64: 1, 64, 1>}]} {
    %c0 = arith.constant 0 : index
    %c0_0 = arith.constant 0 : index
    %0 = vector.load %arg1[%c0, %c0_0] : memref<64x576xbf16, #tpu.memory_space<vmem>>, vector<64x576xbf16>
    %c0_1 = arith.constant 0 : index
    %c0_2 = arith.constant 0 : index
    %1 = vector.load %arg2[%c0_1, %c0_2] : memref<576x128xbf16, #tpu.memory_space<vmem>>, vector<576x128xbf16>
    %cst = arith.constant dense<0.000000e+00> : vector<64x128xf32>
    %2 = tpu.matmul %0, %1, %cst {dimension_numbers = #tpu.dot_dimension_numbers<[1], [0], [0], [1], [0, 0, 1, 1], [], []>} : vector<64x576xbf16>, vector<576x128xbf16>, vector<64x128xf32> -> vector<64x128xf32>
    %c0_3 = arith.constant 0 : index
    %c0_4 = arith.constant 0 : index
    %3 = vector.load %arg3[%c0_3, %c0_4] : memref<64x128xf32, #tpu.memory_space<vmem>>, vector<64x128xf32>
    tpu.vector_store %arg3[%c0_3, %c0_4], %2 {strides = array<i32>} : memref<64x128xf32, #tpu.memory_space<vmem>>, vector<64x128xf32>,
    %cst_5 = arith.constant dense<0.000000e+00> : vector<64xf32>
    %4 = vector.multi_reduction <add>, %2, %cst_5 [1] : vector<64x128xf32> to vector<64xf32>
    %5 = vector.shape_cast %4 : vector<64xf32> to vector<64x1xf32>
    %6 = vector.shape_cast %5 : vector<64x1xf32> to vector<1x64x1xf32>
    %c0_6 = arith.constant 0 : index
    %c0_7 = arith.constant 0 : index
    %c0_8 = arith.constant 0 : index
    %7 = vector.load %arg4[%c0_6, %c0_7, %c0_8] : memref<1x64x1xf32, #tpu.memory_space<vmem>>, vector<1x64x1xf32>
    tpu.vector_store %arg4[%c0_6, %c0_7, %c0_8], %6 {strides = array<i32>} : memref<1x64x1xf32, #tpu.memory_space<vmem>>, vector<1x64x1xf32>,
    %8 = arith.mulf %2, %2 : vector<64x128xf32>
    %cst_9 = arith.constant dense<0.000000e+00> : vector<64xf32>
    %9 = vector.multi_reduction <add>, %8, %cst_9 [1] : vector<64x128xf32> to vector<64xf32>
    %10 = vector.shape_cast %9 : vector<64xf32> to vector<64x1xf32>
    %11 = vector.shape_cast %10 : vector<64x1xf32> to vector<1x64x1xf32>
    %c0_10 = arith.constant 0 : index
    %c0_11 = arith.constant 0 : index
    %c0_12 = arith.constant 0 : index
    %12 = vector.load %arg5[%c0_10, %c0_11, %c0_12] : memref<1x64x1xf32, #tpu.memory_space<vmem>>, vector<1x64x1xf32>
    tpu.vector_store %arg5[%c0_10, %c0_11, %c0_12], %11 {strides = array<i32>} : memref<1x64x1xf32, #tpu.memory_space<vmem>>, vector<1x64x1xf32>,
    return
  }
  func.func @transform_0(%arg0: i32) -> (i32, i32) {
    %c0_i32 = arith.constant 0 : i32
    %c0_i32_0 = arith.constant 0 : i32
    %c0_i32_1 = arith.constant 0 : i32
    return %c0_i32, %c0_i32_0 : i32, i32
  }
  func.func @transform_1(%arg0: i32) -> (i32, i32) {
    %c0_i32 = arith.constant 0 : i32
    %c0_i32_0 = arith.constant 0 : i32
    return %c0_i32, %arg0 : i32, i32
  }
  func.func @transform_2(%arg0: i32) -> (i32, i32) {
    %c0_i32 = arith.constant 0 : i32
    %c0_i32_0 = arith.constant 0 : i32
    return %c0_i32, %arg0 : i32, i32
  }
  func.func @transform_3(%arg0: i32) -> (i32, i32, i32) {
    %c0_i32 = arith.constant 0 : i32
    %c0_i32_0 = arith.constant 0 : i32
    %c0_i32_1 = arith.constant 0 : i32
    return %arg0, %c0_i32, %c0_i32_0 : i32, i32, i32
  }
  func.func @transform_4(%arg0: i32) -> (i32, i32, i32) {
    %c0_i32 = arith.constant 0 : i32
    %c0_i32_0 = arith.constant 0 : i32
    %c0_i32_1 = arith.constant 0 : i32
    return %arg0, %c0_i32, %c0_i32_0 : i32, i32, i32
  }
}

module attributes {stable_mosaic.version = 11 : i64} {
  func.func @_bn_kernel(%arg0: i32, %arg1: memref<64x1xf32, #tpu.memory_space<vmem>>, %arg2: memref<64x1xf32, #tpu.memory_space<vmem>>, %arg3: memref<64x128xf32, #tpu.memory_space<vmem>>, %arg4: memref<64x128xf32, #tpu.memory_space<vmem>>) attributes {dimension_semantics = [#tpu.dimension_semantics<parallel>], iteration_bounds = array<i64: 1>, scalar_prefetch = 0 : i64, scratch_operands = 0 : i64, tpu.core_type = #tpu.core_type<tc>, window_params = [{pipeline_mode = #tpu.pipeline_mode<synchronous>, transform_indices = @transform_0, window_bounds = array<i64: 64, 1>}, {pipeline_mode = #tpu.pipeline_mode<synchronous>, transform_indices = @transform_1, window_bounds = array<i64: 64, 1>}, {transform_indices = @transform_2, window_bounds = array<i64: 64, 128>}, {transform_indices = @transform_3, window_bounds = array<i64: 64, 128>}]} {
    %c0 = arith.constant 0 : index
    %c0_0 = arith.constant 0 : index
    %0 = vector.load %arg3[%c0, %c0_0] : memref<64x128xf32, #tpu.memory_space<vmem>>, vector<64x128xf32>
    %c0_1 = arith.constant 0 : index
    %c0_2 = arith.constant 0 : index
    %1 = vector.load %arg1[%c0_1, %c0_2] : memref<64x1xf32, #tpu.memory_space<vmem>>, vector<64x1xf32>
    %2 = vector.broadcast %1 : vector<64x1xf32> to vector<64x128xf32>
    %3 = arith.mulf %0, %2 : vector<64x128xf32>
    %c0_3 = arith.constant 0 : index
    %c0_4 = arith.constant 0 : index
    %4 = vector.load %arg2[%c0_3, %c0_4] : memref<64x1xf32, #tpu.memory_space<vmem>>, vector<64x1xf32>
    %5 = vector.broadcast %4 : vector<64x1xf32> to vector<64x128xf32>
    %6 = arith.addf %3, %5 : vector<64x128xf32>
    %c0_5 = arith.constant 0 : index
    %c0_6 = arith.constant 0 : index
    %7 = vector.load %arg4[%c0_5, %c0_6] : memref<64x128xf32, #tpu.memory_space<vmem>>, vector<64x128xf32>
    tpu.vector_store %arg4[%c0_5, %c0_6], %6 {strides = array<i32>} : memref<64x128xf32, #tpu.memory_space<vmem>>, vector<64x128xf32>,
    return
  }
  func.func @transform_0(%arg0: i32) -> (i32, i32) {
    %c0_i32 = arith.constant 0 : i32
    %c0_i32_0 = arith.constant 0 : i32
    %c0_i32_1 = arith.constant 0 : i32
    return %c0_i32, %c0_i32_0 : i32, i32
  }
  func.func @transform_1(%arg0: i32) -> (i32, i32) {
    %c0_i32 = arith.constant 0 : i32
    %c0_i32_0 = arith.constant 0 : i32
    %c0_i32_1 = arith.constant 0 : i32
    return %c0_i32, %c0_i32_0 : i32, i32
  }
  func.func @transform_2(%arg0: i32) -> (i32, i32) {
    %c0_i32 = arith.constant 0 : i32
    %c0_i32_0 = arith.constant 0 : i32
    return %c0_i32, %arg0 : i32, i32
  }
  func.func @transform_3(%arg0: i32) -> (i32, i32) {
    %c0_i32 = arith.constant 0 : i32
    %c0_i32_0 = arith.constant 0 : i32
    return %c0_i32, %arg0 : i32, i32
  }
}

module attributes {stable_mosaic.version = 11 : i64} {
  func.func @_bn_kernel(%arg0: i32, %arg1: memref<64x1xf32, #tpu.memory_space<vmem>>, %arg2: memref<64x1xf32, #tpu.memory_space<vmem>>, %arg3: memref<64x512xf32, #tpu.memory_space<vmem>>, %arg4: memref<64x512xf32, #tpu.memory_space<vmem>>) attributes {dimension_semantics = [#tpu.dimension_semantics<parallel>], iteration_bounds = array<i64: 1>, scalar_prefetch = 0 : i64, scratch_operands = 0 : i64, tpu.core_type = #tpu.core_type<tc>, window_params = [{pipeline_mode = #tpu.pipeline_mode<synchronous>, transform_indices = @transform_0, window_bounds = array<i64: 64, 1>}, {pipeline_mode = #tpu.pipeline_mode<synchronous>, transform_indices = @transform_1, window_bounds = array<i64: 64, 1>}, {transform_indices = @transform_2, window_bounds = array<i64: 64, 512>}, {transform_indices = @transform_3, window_bounds = array<i64: 64, 512>}]} {
    %c0 = arith.constant 0 : index
    %c0_0 = arith.constant 0 : index
    %0 = vector.load %arg3[%c0, %c0_0] : memref<64x512xf32, #tpu.memory_space<vmem>>, vector<64x512xf32>
    %c0_1 = arith.constant 0 : index
    %c0_2 = arith.constant 0 : index
    %1 = vector.load %arg1[%c0_1, %c0_2] : memref<64x1xf32, #tpu.memory_space<vmem>>, vector<64x1xf32>
    %2 = vector.broadcast %1 : vector<64x1xf32> to vector<64x512xf32>
    %3 = arith.mulf %0, %2 : vector<64x512xf32>
    %c0_3 = arith.constant 0 : index
    %c0_4 = arith.constant 0 : index
    %4 = vector.load %arg2[%c0_3, %c0_4] : memref<64x1xf32, #tpu.memory_space<vmem>>, vector<64x1xf32>
    %5 = vector.broadcast %4 : vector<64x1xf32> to vector<64x512xf32>
    %6 = arith.addf %3, %5 : vector<64x512xf32>
    %c0_5 = arith.constant 0 : index
    %c0_6 = arith.constant 0 : index
    %7 = vector.load %arg4[%c0_5, %c0_6] : memref<64x512xf32, #tpu.memory_space<vmem>>, vector<64x512xf32>
    tpu.vector_store %arg4[%c0_5, %c0_6], %6 {strides = array<i32>} : memref<64x512xf32, #tpu.memory_space<vmem>>, vector<64x512xf32>,
    return
  }
  func.func @transform_0(%arg0: i32) -> (i32, i32) {
    %c0_i32 = arith.constant 0 : i32
    %c0_i32_0 = arith.constant 0 : i32
    %c0_i32_1 = arith.constant 0 : i32
    return %c0_i32, %c0_i32_0 : i32, i32
  }
  func.func @transform_1(%arg0: i32) -> (i32, i32) {
    %c0_i32 = arith.constant 0 : i32
    %c0_i32_0 = arith.constant 0 : i32
    %c0_i32_1 = arith.constant 0 : i32
    return %c0_i32, %c0_i32_0 : i32, i32
  }
  func.func @transform_2(%arg0: i32) -> (i32, i32) {
    %c0_i32 = arith.constant 0 : i32
    %c0_i32_0 = arith.constant 0 : i32
    return %c0_i32, %arg0 : i32, i32
  }
  func.func @transform_3(%arg0: i32) -> (i32, i32) {
    %c0_i32 = arith.constant 0 : i32
    %c0_i32_0 = arith.constant 0 : i32
    return %c0_i32, %arg0 : i32, i32
  }
}

</mosaic_0001>

<bundles_post_ra>
// kernel: usrm4_forward.19
= control target key start
LH: loop header
LB: loop body
LE: loop exit
PB: predicated region body
PF: predicated region fallthrough
CT: control target
= control target key end

     0   :  { %v312_v0 = vmov 0   ;;  %s746_s0 = inlined_call_operand.vmem [shape: f32[64,1], index: 0, kind: input, shape index: {}]   ;;  %s747_s1 = inlined_call_operand.vmem [shape: f32[64,1], index: 1, kind: input, shape index: {}]   ;;  %s748_s2 = inlined_call_operand.vmem [shape: f32[64,512], index: 2, kind: input, shape index: {}]   ;;  %s749_s3 = inlined_call_operand.vmem [shape: f32[64,512], index: 3, kind: input, shape index: {}]   ;;  %s750_s4 = inlined_call_operand.vmem [shape: f32[64,512], index: 4, kind: output, shape index: {}]  }
   0x1   :  { %311 = vset.pattern.permute.xlu1 %v312_v0  ;;  %310 = vset.pattern.permute.xlu0 %v312_v0  ;;  %v51_v1 = vld [vmem:[%s746_s0 + $0x10] sm:$0xff]  ;;  %v49_v2 = vld [vmem:[%s746_s0] sm:$0xff]  ;;  %v52_v3 = vld [vmem:[%s746_s0 + $0x18] sm:$0xff] }
   0x2   :  { %69 = vperm.xlu1 %311, %v51_v1   ;;  %59 = vperm.xlu0 %310, %v49_v2   ;;  %v50_v4 = vld [vmem:[%s746_s0 + $0x8] sm:$0xff]  ;;  %v53_v6 = vld [vmem:[%s746_s0 + $0x20] sm:$0xff]  ;;  %v56_v7 = vld [vmem:[%s746_s0 + $0x38] sm:$0xff] }
   0x3   :  { %v54_v5 = vld [vmem:[%s746_s0 + $0x28] sm:$0xff]  ;;  %v55_v8 = vld [vmem:[%s746_s0 + $0x30] sm:$0xff]  ;;  %v129_v10 = vld [vmem:[%s747_s1] sm:$0xff] }
   0x4   :  { %v130_v9 = vld [vmem:[%s747_s1 + $0x8] sm:$0xff]  ;;  %v132_v11 = vld [vmem:[%s747_s1 + $0x18] sm:$0xff]  ;;  %v131_v12 = vld [vmem:[%s747_s1 + $0x10] sm:$0xff] }
   0x5   :  { %v134_v13 = vld [vmem:[%s747_s1 + $0x28] sm:$0xff]  ;;  %v133_v14 = vld [vmem:[%s747_s1 + $0x20] sm:$0xff]  ;;  %v136_v15 = vld [vmem:[%s747_s1 + $0x38] sm:$0xff] }
   0x6   :  { %74 = vperm.xlu1 %311, %v52_v3   ;;  %64 = vperm.xlu0 %310, %v50_v4   ;;  %v135_v16 = vld [vmem:[%s747_s1 + $0x30] sm:$0xff]  ;;  %v25_v19 = vld [vmem:[%s748_s2 + $0x40] sm:$0xff]  ;;  %v26_v20 = vld [vmem:[%s748_s2 + $0x48] sm:$0xff] }
   0x7   :  { %v27_v21 = vld [vmem:[%s748_s2 + $0x50] sm:$0xff]  ;;  %v28_v22 = vld [vmem:[%s748_s2 + $0x58] sm:$0xff]  ;;  %v17_v25 = vld [vmem:[%s748_s2] sm:$0xff] }
   0x8   :  { %v18_v26 = vld [vmem:[%s748_s2 + $0x8] sm:$0xff]  ;;  %v19_v27 = vld [vmem:[%s748_s2 + $0x10] sm:$0xff]  ;;  %v20_v28 = vld [vmem:[%s748_s2 + $0x18] sm:$0xff] }
   0x9   :  { %v29_v29 = vld [vmem:[%s748_s2 + $0x60] sm:$0xff]  ;;  %v30_v30 = vld [vmem:[%s748_s2 + $0x68] sm:$0xff]  ;;  %v31_v31 = vld [vmem:[%s748_s2 + $0x70] sm:$0xff] }
   0xa   :  { %84 = vperm.xlu1 %311, %v54_v5   ;;  %79 = vperm.xlu0 %310, %v53_v6   ;;  %v32_v32 = vld [vmem:[%s748_s2 + $0x78] sm:$0xff]  ;;  %v21_v33 = vld [vmem:[%s748_s2 + $0x20] sm:$0xff]  ;;  %v22_v34 = vld [vmem:[%s748_s2 + $0x28] sm:$0xff] }
   0xb   :  { %v23_v35 = vld [vmem:[%s748_s2 + $0x30] sm:$0xff]  ;;  %v24_v36 = vld [vmem:[%s748_s2 + $0x38] sm:$0xff]  ;;  %v37_v37 = vld [vmem:[%s748_s2 + $0xa0] sm:$0xff] }
   0xc   :  { %v38_v44 = vld [vmem:[%s748_s2 + $0xa8] sm:$0xff]  ;;  %v39_v45 = vld [vmem:[%s748_s2 + $0xb0] sm:$0xff]  ;;  %v40_v46 = vld [vmem:[%s748_s2 + $0xb8] sm:$0xff] }
   0xd   :  { %v33_v51 = vld [vmem:[%s748_s2 + $0x80] sm:$0xff]  ;;  %v34_v52 = vld [vmem:[%s748_s2 + $0x88] sm:$0xff]  ;;  %v35_v53 = vld [vmem:[%s748_s2 + $0x90] sm:$0xff] }
   0xe   :  { %94 = vperm.xlu1 %311, %v56_v7   ;;  %89 = vperm.xlu0 %310, %v55_v8   ;;  %v36_v58 = vld [vmem:[%s748_s2 + $0x98] sm:$0xff]  ;;  %v45_v59 = vld [vmem:[%s748_s2 + $0xe0] sm:$0xff]  ;;  %v46_v60 = vld [vmem:[%s748_s2 + $0xe8] sm:$0xff] }
   0xf   :  { %v47_v3 = vld [vmem:[%s748_s2 + $0xf0] sm:$0xff]  ;;  %v48_v4 = vld [vmem:[%s748_s2 + $0xf8] sm:$0xff]  ;;  %v41_v5 = vld [vmem:[%s748_s2 + $0xc0] sm:$0xff] }
  0x12   :  { %144 = vperm.xlu1 %311, %v130_v9   ;;  %139 = vperm.xlu0 %310, %v129_v10   ;;  %v42_v10 = vld [vmem:[%s748_s2 + $0xc8] sm:$0xff] }
  0x16   :  { %154 = vperm.xlu1 %311, %v132_v11   ;;  %149 = vperm.xlu0 %310, %v131_v12   ;;  %v43_v11 = vld [vmem:[%s748_s2 + $0xd0] sm:$0xff]  ;;  %v44_v12 = vld [vmem:[%s748_s2 + $0xd8] sm:$0xff] }
  0x1a   :  { %164 = vperm.xlu1 %311, %v134_v13   ;;  %159 = vperm.xlu0 %310, %v133_v14  }
  0x1e   :  { %174 = vperm.xlu1 %311, %v136_v15   ;;  %169 = vperm.xlu0 %310, %v135_v16  }
  0x81   :  { %v70_v17 = vpop.permute.xlu1 %69  ;;  %v60_v18 = vpop.permute.xlu0 %59 }
  0x82   :  { %v437_v40 = vmul.f32 %v70_v17, %v25_v19  ;;  %v439_v41 = vmul.f32 %v70_v17, %v26_v20  ;;  %v441_v42 = vmul.f32 %v70_v17, %v27_v21  ;;  %v443_v43 = vmul.f32 %v70_v17, %v28_v22  ;;  %v213_v17 = vld [vmem:[%s749_s3 + $0x20] sm:$0xff] }
  0x83   :  { %v97_v47 = vmul.f32 %v60_v18, %v17_v25  ;;  %v98_v48 = vmul.f32 %v60_v18, %v18_v26  ;;  %v99_v49 = vmul.f32 %v60_v18, %v19_v27  ;;  %v100_v50 = vmul.f32 %v60_v18, %v20_v28  ;;  %v214_v18 = vld [vmem:[%s749_s3 + $0x28] sm:$0xff]  ;;  %v209_v26 = vld [vmem:[%s749_s3] sm:$0xff] }
  0x85   :  { %v75_v23 = vpop.permute.xlu1 %74  ;;  %v65_v24 = vpop.permute.xlu0 %64 }
  0x86   :  { %v463_v54 = vmul.f32 %v75_v23, %v29_v29  ;;  %v465_v55 = vmul.f32 %v75_v23, %v30_v30  ;;  %v467_v56 = vmul.f32 %v75_v23, %v31_v31  ;;  %v469_v57 = vmul.f32 %v75_v23, %v32_v32  ;;  %v215_v23 = vld [vmem:[%s749_s3 + $0x30] sm:$0xff] }
  0x87   :  { %v101_v61 = vmul.f32 %v65_v24, %v21_v33  ;;  %v102_v62 = vmul.f32 %v65_v24, %v22_v34  ;;  %v103_v63 = vmul.f32 %v65_v24, %v23_v35  ;;  %v104_v0 = vmul.f32 %v65_v24, %v24_v36  ;;  %v216_v24 = vld [vmem:[%s749_s3 + $0x38] sm:$0xff]  ;;  %v210_v36 = vld [vmem:[%s749_s3 + $0x8] sm:$0xff] }
  0x89   :  { %v85_v38 = vpop.permute.xlu1 %84  ;;  %v80_v39 = vpop.permute.xlu0 %79 }
  0x8a   :  { %v489_v6 = vmul.f32 %v85_v38, %v37_v37  ;;  %v491_v7 = vmul.f32 %v85_v38, %v38_v44  ;;  %v493_v8 = vmul.f32 %v85_v38, %v39_v45  ;;  %v495_v9 = vmul.f32 %v85_v38, %v40_v46  ;;  %v211_v37 = vld [vmem:[%s749_s3 + $0x10] sm:$0xff]  ;;  %v212_v38 = vld [vmem:[%s749_s3 + $0x18] sm:$0xff] }
  0x8b   :  { %v506_v13 = vmul.f32 %v80_v39, %v33_v51  ;;  %v508_v14 = vmul.f32 %v80_v39, %v34_v52  ;;  %v510_v15 = vmul.f32 %v80_v39, %v35_v53  ;;  %v512_v16 = vmul.f32 %v80_v39, %v36_v58 }
  0x8d   :  { %v95_v1 = vpop.permute.xlu1 %94  ;;  %v90_v2 = vpop.permute.xlu0 %89 }
  0x8e   :  { %v520_v19 = vmul.f32 %v95_v1, %v45_v59  ;;  %v522_v20 = vmul.f32 %v95_v1, %v46_v60  ;;  %v524_v21 = vmul.f32 %v95_v1, %v47_v3  ;;  %v526_v22 = vmul.f32 %v95_v1, %v48_v4  ;;  %v221_v59 = vld [vmem:[%s749_s3 + $0x60] sm:$0xff]  ;;  %v222_v60 = vld [vmem:[%s749_s3 + $0x68] sm:$0xff] }
  0x8f   :  { %v537_v28 = vmul.f32 %v90_v2, %v41_v5  ;;  %v539_v29 = vmul.f32 %v90_v2, %v42_v10  ;;  %v541_v30 = vmul.f32 %v90_v2, %v43_v11  ;;  %v543_v31 = vmul.f32 %v90_v2, %v44_v12  ;;  %v218_v10 = vld [vmem:[%s749_s3 + $0x48] sm:$0xff]  ;;  %v219_v11 = vld [vmem:[%s749_s3 + $0x50] sm:$0xff]  ;;  %v220_v12 = vld [vmem:[%s749_s3 + $0x58] sm:$0xff] }
  0x91   :  { %v145_v25 = vpop.permute.xlu1 %144  ;;  %v140_v27 = vpop.permute.xlu0 %139 }
  0x92   :  { %v181_v32 = vadd.f32 %v145_v25, %v101_v61  ;;  %v182_v33 = vadd.f32 %v145_v25, %v102_v62  ;;  %v183_v34 = vadd.f32 %v145_v25, %v103_v63  ;;  %v184_v35 = vadd.f32 %v145_v25, %v104_v0  ;;  %v229_v25 = vld [vmem:[%s749_s3 + $0xa0] sm:$0xff] }
  0x93   :  { %v177_v39 = vadd.f32 %v140_v27, %v97_v47  ;;  %v178_v44 = vadd.f32 %v140_v27, %v98_v48  ;;  %v179_v45 = vadd.f32 %v140_v27, %v99_v49  ;;  %v180_v46 = vadd.f32 %v140_v27, %v100_v50  ;;  %v223_v47 = vld [vmem:[%s749_s3 + $0x70] sm:$0xff]  ;;  %v224_v48 = vld [vmem:[%s749_s3 + $0x78] sm:$0xff]  ;;  %v217_v50 = vld [vmem:[%s749_s3 + $0x40] sm:$0xff] }
  0x94   :  { %v245_v51 = vadd.f32 %v213_v17, %v181_v32  ;;  %v246_v52 = vadd.f32 %v214_v18, %v182_v33  ;;  %v247_v53 = vadd.f32 %v215_v23, %v183_v34  ;;  %v248_v58 = vadd.f32 %v216_v24, %v184_v35  ;;  %v225_v34 = vld [vmem:[%s749_s3 + $0x80] sm:$0xff] }
  0x95   :  { %v241_v61 = vadd.f32 %v209_v26, %v177_v39  ;;  %v242_v62 = vadd.f32 %v210_v36, %v178_v44  ;;  %v243_v63 = vadd.f32 %v211_v37, %v179_v45  ;;  %v244_v0 = vadd.f32 %v212_v38, %v180_v46  ;;  %v155_v49 = vpop.permute.xlu1 %154  ;;  %v150_v1 = vpop.permute.xlu0 %149  ;;  %v230_v26 = vld [vmem:[%s749_s3 + $0xa8] sm:$0xff]  ;;  %v227_v45 = vld [vmem:[%s749_s3 + $0x90] sm:$0xff]  ;;  %v228_v46 = vld [vmem:[%s749_s3 + $0x98] sm:$0xff] }
  0x96   :  { %277 = vst [vmem:[%s750_s4 + $0x20] sm:$0xff] %v245_v51  ;;  %278 = vst [vmem:[%s750_s4 + $0x28] sm:$0xff] %v246_v52  ;;  %v189_v2 = vadd.f32 %v155_v49, %v463_v54  ;;  %v190_v3 = vadd.f32 %v155_v49, %v465_v55  ;;  %v191_v4 = vadd.f32 %v155_v49, %v467_v56  ;;  %v226_v44 = vld [vmem:[%s749_s3 + $0x88] sm:$0xff] }
  0x97   :  { %279 = vst [vmem:[%s750_s4 + $0x30] sm:$0xff] %v247_v53  ;;  %280 = vst [vmem:[%s750_s4 + $0x38] sm:$0xff] %v248_v58  ;;  %v192_v5 = vadd.f32 %v155_v49, %v469_v57  ;;  %v185_v54 = vadd.f32 %v150_v1, %v437_v40  ;;  %v186_v55 = vadd.f32 %v150_v1, %v439_v41 }
  0x98   :  { %273 = vst [vmem:[%s750_s4] sm:$0xff] %v241_v61  ;;  %274 = vst [vmem:[%s750_s4 + $0x8] sm:$0xff] %v242_v62  ;;  %v187_v56 = vadd.f32 %v150_v1, %v441_v42  ;;  %v188_v57 = vadd.f32 %v150_v1, %v443_v43  ;;  %v253_v17 = vadd.f32 %v221_v59, %v189_v2  ;;  %v231_v42 = vld [vmem:[%s749_s3 + $0xb0] sm:$0xff]  ;;  %v232_v43 = vld [vmem:[%s749_s3 + $0xb8] sm:$0xff] }
  0x99   :  { %275 = vst [vmem:[%s750_s4 + $0x10] sm:$0xff] %v243_v63  ;;  %276 = vst [vmem:[%s750_s4 + $0x18] sm:$0xff] %v244_v0  ;;  %v254_v18 = vadd.f32 %v222_v60, %v190_v3  ;;  %v255_v23 = vadd.f32 %v223_v47, %v191_v4  ;;  %v256_v24 = vadd.f32 %v224_v48, %v192_v5  ;;  %v165_v33 = vpop.permute.xlu1 %164  ;;  %v160_v35 = vpop.permute.xlu0 %159  ;;  %v237_v59 = vld [vmem:[%s749_s3 + $0xe0] sm:$0xff]  ;;  %v238_v60 = vld [vmem:[%s749_s3 + $0xe8] sm:$0xff] }
  0x9a   :  { %v249_v27 = vadd.f32 %v217_v50, %v185_v54  ;;  %v250_v40 = vadd.f32 %v218_v10, %v186_v55  ;;  %v251_v32 = vadd.f32 %v219_v11, %v187_v56  ;;  %v252_v41 = vadd.f32 %v220_v12, %v188_v57  ;;  %285 = vst [vmem:[%s750_s4 + $0x60] sm:$0xff] %v253_v17  ;;  %v233_v0 = vld [vmem:[%s749_s3 + $0xc0] sm:$0xff]  ;;  %v234_v2 = vld [vmem:[%s749_s3 + $0xc8] sm:$0xff]  ;;  %v235_v3 = vld [vmem:[%s749_s3 + $0xd0] sm:$0xff] }
  0x9b   :  { %286 = vst [vmem:[%s750_s4 + $0x68] sm:$0xff] %v254_v18  ;;  %287 = vst [vmem:[%s750_s4 + $0x70] sm:$0xff] %v255_v23  ;;  %v197_v36 = vadd.f32 %v165_v33, %v489_v6  ;;  %v198_v37 = vadd.f32 %v165_v33, %v491_v7  ;;  %v199_v38 = vadd.f32 %v165_v33, %v493_v8  ;;  %v236_v4 = vld [vmem:[%s749_s3 + $0xd8] sm:$0xff] }
  0x9c   :  { %288 = vst [vmem:[%s750_s4 + $0x78] sm:$0xff] %v256_v24  ;;  %v200_v39 = vadd.f32 %v165_v33, %v495_v9  ;;  %281 = vst [vmem:[%s750_s4 + $0x40] sm:$0xff] %v249_v27  ;;  %v193_v6 = vadd.f32 %v160_v35, %v506_v13  ;;  %v194_v7 = vadd.f32 %v160_v35, %v508_v14 }
  0x9d   :  { %282 = vst [vmem:[%s750_s4 + $0x48] sm:$0xff] %v250_v40  ;;  %283 = vst [vmem:[%s750_s4 + $0x50] sm:$0xff] %v251_v32  ;;  %v195_v8 = vadd.f32 %v160_v35, %v510_v15  ;;  %v196_v9 = vadd.f32 %v160_v35, %v512_v16  ;;  %v261_v51 = vadd.f32 %v229_v25, %v197_v36  ;;  %v239_v15 = vld [vmem:[%s749_s3 + $0xf0] sm:$0xff]  ;;  %v240_v16 = vld [vmem:[%s749_s3 + $0xf8] sm:$0xff]  ;;  %v175_v63 = vpop.permute.xlu1 %174  ;;  %v170_v47 = vpop.permute.xlu0 %169 }
  0x9e   :  { %284 = vst [vmem:[%s750_s4 + $0x58] sm:$0xff] %v252_v41  ;;  %v262_v52 = vadd.f32 %v230_v26, %v198_v37  ;;  %v263_v53 = vadd.f32 %v231_v42, %v199_v38  ;;  %v264_v58 = vadd.f32 %v232_v43, %v200_v39  ;;  %v257_v61 = vadd.f32 %v225_v34, %v193_v6 }
  0x9f   :  { %v258_v13 = vadd.f32 %v226_v44, %v194_v7  ;;  %v259_v62 = vadd.f32 %v227_v45, %v195_v8  ;;  %v260_v14 = vadd.f32 %v228_v46, %v196_v9  ;;  %293 = vst [vmem:[%s750_s4 + $0xa0] sm:$0xff] %v261_v51  ;;  %v205_v48 = vadd.f32 %v175_v63, %v520_v19 }
  0xa0   :  { %294 = vst [vmem:[%s750_s4 + $0xa8] sm:$0xff] %v262_v52  ;;  %295 = vst [vmem:[%s750_s4 + $0xb0] sm:$0xff] %v263_v53  ;;  %v206_v49 = vadd.f32 %v175_v63, %v522_v20  ;;  %v207_v50 = vadd.f32 %v175_v63, %v524_v21  ;;  %v208_v1 = vadd.f32 %v175_v63, %v526_v22 }
  0xa1   :  { %296 = vst [vmem:[%s750_s4 + $0xb8] sm:$0xff] %v264_v58  ;;  %289 = vst [vmem:[%s750_s4 + $0x80] sm:$0xff] %v257_v61  ;;  %v201_v19 = vadd.f32 %v170_v47, %v537_v28  ;;  %v202_v20 = vadd.f32 %v170_v47, %v539_v29  ;;  %v203_v21 = vadd.f32 %v170_v47, %v541_v30 }
  0xa2   :  { %290 = vst [vmem:[%s750_s4 + $0x88] sm:$0xff] %v258_v13  ;;  %291 = vst [vmem:[%s750_s4 + $0x90] sm:$0xff] %v259_v62  ;;  %v204_v22 = vadd.f32 %v170_v47, %v543_v31  ;;  %v269_v5 = vadd.f32 %v237_v59, %v205_v48  ;;  %v270_v10 = vadd.f32 %v238_v60, %v206_v49 }
  0xa3   :  { %292 = vst [vmem:[%s750_s4 + $0x98] sm:$0xff] %v260_v14  ;;  %v271_v11 = vadd.f32 %v239_v15, %v207_v50  ;;  %v272_v12 = vadd.f32 %v240_v16, %v208_v1  ;;  %v265_v54 = vadd.f32 %v233_v0, %v201_v19  ;;  %v266_v55 = vadd.f32 %v234_v2, %v202_v20 }
  0xa4   :  { %v267_v56 = vadd.f32 %v235_v3, %v203_v21  ;;  %v268_v57 = vadd.f32 %v236_v4, %v204_v22  ;;  %301 = vst [vmem:[%s750_s4 + $0xe0] sm:$0xff] %v269_v5  ;;  %302 = vst [vmem:[%s750_s4 + $0xe8] sm:$0xff] %v270_v10 }
  0xa5   :  { %303 = vst [vmem:[%s750_s4 + $0xf0] sm:$0xff] %v271_v11  ;;  %304 = vst [vmem:[%s750_s4 + $0xf8] sm:$0xff] %v272_v12 }
  0xa6   :  { %297 = vst [vmem:[%s750_s4 + $0xc0] sm:$0xff] %v265_v54  ;;  %298 = vst [vmem:[%s750_s4 + $0xc8] sm:$0xff] %v266_v55 }
  0xa7   :  { %299 = vst [vmem:[%s750_s4 + $0xd0] sm:$0xff] %v267_v56  ;;  %300 = vst [vmem:[%s750_s4 + $0xd8] sm:$0xff] %v268_v57 }

// kernel: usrm4_forward.18
= control target key start
LH: loop header
LB: loop body
LE: loop exit
PB: predicated region body
PF: predicated region fallthrough
CT: control target
= control target key end

     0   :  { %vm1003_vm0 = vcmask 523264   ;;  %vm1526_vm1 = vcmask 7168   ;;  %s2794_s1 = inlined_call_operand.vmem [shape: bf16[576,512], index: 1, kind: input, shape index: {}]   ;;  %s2795_s0 = inlined_call_operand.vmem [shape: bf16[64,576], index: 0, kind: input, shape index: {}]   ;;  %s2796_s2 = inlined_call_operand.vmem [shape: f32[64,512], index: 2, kind: output, shape index: {0}]   ;;  %s2797_s3 = inlined_call_operand.vmem [shape: f32[1,64,1], index: 3, kind: output, shape index: {1}]   ;;  %s2798_s4 = inlined_call_operand.vmem [shape: f32[1,64,1], index: 4, kind: output, shape index: {2}]  }
   0x1   :  { %v1864_v0 = vld [vmem:[%s2794_s1 + $0x4] ss:$16 sps:$4 sm:$0xff]   ;;  %v1866_v1 = vld [vmem:[%s2794_s1 + $0xc] ss:$16 sps:$4 sm:$0xff]   ;;  %v1868_v2 = vld [vmem:[%s2794_s1] ss:$16 sps:$4 sm:$0xff]  }
   0x2   :  { %1016 = vmatprep.subr.bf16.mxu0 %v1864_v0  ;;  %v1869_v3 = vld [vmem:[%s2794_s1 + $0x8] ss:$16 sps:$4 sm:$0xff]   ;;  %1235 = vmatprep.subr.bf16.mxu1 %v1866_v1  ;;  %v1870_v4 = vld [vmem:[%s2794_s1 + $0x24] ss:$16 sps:$4 sm:$0xff]   ;;  %v1872_v5 = vld [vmem:[%s2794_s1 + $0x2c] ss:$16 sps:$4 sm:$0xff]  }
   0x3   :  { %1017 = vmatpush1.bf16.msra.mxu0 %v1868_v2  ;;  %1236 = vmatpush1.bf16.msra.mxu1 %v1869_v3  ;;  %v1874_v6 = vld [vmem:[%s2794_s1 + $0x20] ss:$16 sps:$4 sm:$0xff]   ;;  %v1875_v7 = vld [vmem:[%s2794_s1 + $0x28] ss:$16 sps:$4 sm:$0xff]   ;;  %v1876_v8 = vld [vmem:[%s2794_s1 + $0x44] ss:$16 sps:$4 sm:$0xff]  }
   0x4   :  { %1018 = vmatprep.subr.bf16.mxu0 %v1870_v4  ;;  %1237 = vmatprep.subr.bf16.mxu1 %v1872_v5  ;;  %v1878_v9 = vld [vmem:[%s2794_s1 + $0x4c] ss:$16 sps:$4 sm:$0xff]   ;;  %v1880_v10 = vld [vmem:[%s2794_s1 + $0x40] ss:$16 sps:$4 sm:$0xff]   ;;  %v1881_v11 = vld [vmem:[%s2794_s1 + $0x48] ss:$16 sps:$4 sm:$0xff]  }
   0x5   :  { %v1882_v12 = vld [vmem:[%s2794_s1 + $0x64] ss:$16 sps:$4 sm:$0xff]   ;;  %v1884_v13 = vld [vmem:[%s2794_s1 + $0x6c] ss:$16 sps:$4 sm:$0xff]   ;;  %v1886_v14 = vld [vmem:[%s2794_s1 + $0x60] ss:$16 sps:$4 sm:$0xff]  }
   0x6   :  { %v1887_v15 = vld [vmem:[%s2794_s1 + $0x68] ss:$16 sps:$4 sm:$0xff]   ;;  %v1888_v16 = vld [vmem:[%s2794_s1 + $0x84] ss:$16 sps:$4 sm:$0xff]   ;;  %v1890_v17 = vld [vmem:[%s2794_s1 + $0x8c] ss:$16 sps:$4 sm:$0xff]  }
   0x7   :  { %1019 = vmatpush1.bf16.msra.mxu0 %v1874_v6  ;;  %1238 = vmatpush1.bf16.msra.mxu1 %v1875_v7  ;;  %v1892_v18 = vld [vmem:[%s2794_s1 + $0x80] ss:$16 sps:$4 sm:$0xff]   ;;  %v1893_v19 = vld [vmem:[%s2794_s1 + $0x88] ss:$16 sps:$4 sm:$0xff]   ;;  %v1894_v20 = vld [vmem:[%s2794_s1 + $0xa4] ss:$16 sps:$4 sm:$0xff]  }
   0x8   :  { %1020 = vmatprep.subr.bf16.mxu0 %v1876_v8  ;;  %1239 = vmatprep.subr.bf16.mxu1 %v1878_v9  ;;  %v1896_v21 = vld [vmem:[%s2794_s1 + $0xac] ss:$16 sps:$4 sm:$0xff]   ;;  %v1898_v22 = vld [vmem:[%s2794_s1 + $0xa0] ss:$16 sps:$4 sm:$0xff]   ;;  %v1899_v23 = vld [vmem:[%s2794_s1 + $0xa8] ss:$16 sps:$4 sm:$0xff]  }
   0x9   :  { %v1900_v24 = vld [vmem:[%s2794_s1 + $0xc4] ss:$16 sps:$4 sm:$0xff]   ;;  %v1902_v25 = vld [vmem:[%s2794_s1 + $0xcc] ss:$16 sps:$4 sm:$0xff]   ;;  %v1904_v26 = vld [vmem:[%s2794_s1 + $0xc0] ss:$16 sps:$4 sm:$0xff]  }
   0xa   :  { %v1905_v27 = vld [vmem:[%s2794_s1 + $0xc8] ss:$16 sps:$4 sm:$0xff]   ;;  %v1906_v28 = vld [vmem:[%s2794_s1 + $0xe4] ss:$16 sps:$4 sm:$0xff]   ;;  %v1908_v29 = vld [vmem:[%s2794_s1 + $0xec] ss:$16 sps:$4 sm:$0xff]  }
   0xb   :  { %1021 = vmatpush1.bf16.msra.mxu0 %v1880_v10  ;;  %1240 = vmatpush1.bf16.msra.mxu1 %v1881_v11  ;;  %v1910_v30 = vld [vmem:[%s2794_s1 + $0xe0] ss:$16 sps:$4 sm:$0xff]   ;;  %v1911_v31 = vld [vmem:[%s2794_s1 + $0xe8] ss:$16 sps:$4 sm:$0xff]   ;;  %v1912_v32 = vld [vmem:[%s2794_s1 + $0x104] ss:$16 sps:$4 sm:$0xff]  }
   0xc   :  { %1022 = vmatprep.subr.bf16.mxu0 %v1882_v12  ;;  %1241 = vmatprep.subr.bf16.mxu1 %v1884_v13  ;;  %v1914_v33 = vld [vmem:[%s2794_s1 + $0x10c] ss:$16 sps:$4 sm:$0xff]   ;;  %v1916_v34 = vld [vmem:[%s2794_s1 + $0x100] ss:$16 sps:$4 sm:$0xff]   ;;  %v1917_v35 = vld [vmem:[%s2794_s1 + $0x108] ss:$16 sps:$4 sm:$0xff]  }
   0xd   :  { %v1918_v36 = vld [vmem:[%s2794_s1 + $0x124] ss:$16 sps:$4 sm:$0xff]   ;;  %v1920_v37 = vld [vmem:[%s2794_s1 + $0x12c] ss:$16 sps:$4 sm:$0xff]   ;;  %v1922_v38 = vld [vmem:[%s2794_s1 + $0x120] ss:$16 sps:$4 sm:$0xff]  }
   0xe   :  { %v1923_v39 = vld [vmem:[%s2794_s1 + $0x128] ss:$16 sps:$4 sm:$0xff]   ;;  %v1924_v40 = vld [vmem:[%s2794_s1 + $0x144] ss:$16 sps:$4 sm:$0xff]   ;;  %v1926_v41 = vld [vmem:[%s2794_s1 + $0x14c] ss:$16 sps:$4 sm:$0xff]  }
   0xf   :  { %1023 = vmatpush1.bf16.msra.mxu0 %v1886_v14  ;;  %1242 = vmatpush1.bf16.msra.mxu1 %v1887_v15  ;;  %v1928_v42 = vld [vmem:[%s2794_s1 + $0x140] ss:$16 sps:$4 sm:$0xff]   ;;  %v1929_v43 = vld [vmem:[%s2794_s1 + $0x148] ss:$16 sps:$4 sm:$0xff]   ;;  %v1930_v44 = vld [vmem:[%s2794_s1 + $0x164] ss:$16 sps:$4 sm:$0xff]  }
  0x10   :  { %1024 = vmatprep.subr.bf16.mxu0 %v1888_v16  ;;  %1243 = vmatprep.subr.bf16.mxu1 %v1890_v17  ;;  %v1932_v45 = vld [vmem:[%s2794_s1 + $0x16c] ss:$16 sps:$4 sm:$0xff]   ;;  %v1934_v46 = vld [vmem:[%s2794_s1 + $0x160] ss:$16 sps:$4 sm:$0xff]   ;;  %v1935_v47 = vld [vmem:[%s2794_s1 + $0x168] ss:$16 sps:$4 sm:$0xff]  }
  0x11   :  { %v1962_v48 = vld [vmem:[%s2795_s0 + $0x4] ss:$20 sps:$4 sm:$0xff]   ;;  %v1938_v50 = vld [vmem:[%s2794_s1 + $0x18c] ss:$16 sps:$4 sm:$0xff]   ;;  %v1940_v51 = vld [vmem:[%s2794_s1 + $0x180] ss:$16 sps:$4 sm:$0xff]  }
  0x12   :  { %v1936_v49 = vld [vmem:[%s2794_s1 + $0x184] ss:$16 sps:$4 sm:$0xff]   ;;  %1048 = vmatprep.mubr.bf16.mxu0 %v1962_v48  ;;  %1267 = vmatprep.mubr.bf16.mxu1 %v1962_v48  ;;  %v1941_v52 = vld [vmem:[%s2794_s1 + $0x188] ss:$16 sps:$4 sm:$0xff]   ;;  %v1944_v54 = vld [vmem:[%s2794_s1 + $0x1ac] ss:$16 sps:$4 sm:$0xff]  }
  0x13   :  { %1025 = vmatpush1.bf16.msra.mxu0 %v1892_v18  ;;  %1244 = vmatpush1.bf16.msra.mxu1 %v1893_v19  ;;  %v1942_v53 = vld [vmem:[%s2794_s1 + $0x1a4] ss:$16 sps:$4 sm:$0xff]   ;;  %v1946_v55 = vld [vmem:[%s2794_s1 + $0x1a0] ss:$16 sps:$4 sm:$0xff]   ;;  %v1947_v56 = vld [vmem:[%s2794_s1 + $0x1a8] ss:$16 sps:$4 sm:$0xff]  }
  0x14   :  { %1026 = vmatprep.subr.bf16.mxu0 %v1894_v20  ;;  %1245 = vmatprep.subr.bf16.mxu1 %v1896_v21  ;;  %v1948_v57 = vld [vmem:[%s2794_s1 + $0x1c4] ss:$16 sps:$4 sm:$0xff]   ;;  %v1950_v58 = vld [vmem:[%s2794_s1 + $0x1cc] ss:$16 sps:$4 sm:$0xff]   ;;  %v1952_v59 = vld [vmem:[%s2794_s1 + $0x1c0] ss:$16 sps:$4 sm:$0xff]  }
  0x15   :  { %v1953_v60 = vld [vmem:[%s2794_s1 + $0x1c8] ss:$16 sps:$4 sm:$0xff]   ;;  %v1954_v61 = vld [vmem:[%s2794_s1 + $0x1e4] ss:$16 sps:$4 sm:$0xff]   ;;  %v1956_v62 = vld [vmem:[%s2794_s1 + $0x1ec] ss:$16 sps:$4 sm:$0xff]  }
  0x16   :  { %v1958_v63 = vld [vmem:[%s2794_s1 + $0x1e0] ss:$16 sps:$4 sm:$0xff]   ;;  %v1959_v0 = vld [vmem:[%s2794_s1 + $0x1e8] ss:$16 sps:$4 sm:$0xff]   ;;  %v1965_v1 = vld [vmem:[%s2794_s1 + $0x204] ss:$16 sps:$4 sm:$0xff]  }
  0x17   :  { %1027 = vmatpush1.bf16.msra.mxu0 %v1898_v22  ;;  %1246 = vmatpush1.bf16.msra.mxu1 %v1899_v23  ;;  %v1968_v2 = vld [vmem:[%s2794_s1 + $0x20c] ss:$16 sps:$4 sm:$0xff]   ;;  %v1960_v3 = vld [vmem:[%s2795_s0] ss:$20 sps:$4 sm:$0xff]   ;;  %v1966_v5 = vld [vmem:[%s2794_s1 + $0x208] ss:$16 sps:$4 sm:$0xff]  }
  0x18   :  { %1028 = vmatprep.subr.bf16.mxu0 %v1900_v24  ;;  %1247 = vmatprep.subr.bf16.mxu1 %v1902_v25  ;;  %v1963_v4 = vld [vmem:[%s2794_s1 + $0x200] ss:$16 sps:$4 sm:$0xff]   ;;  %v1971_v6 = vld [vmem:[%s2794_s1 + $0x224] ss:$16 sps:$4 sm:$0xff]   ;;  %v1974_v7 = vld [vmem:[%s2794_s1 + $0x22c] ss:$16 sps:$4 sm:$0xff]  }
  0x19   :  { %v1969_v8 = vld [vmem:[%s2794_s1 + $0x220] ss:$16 sps:$4 sm:$0xff]   ;;  %v1972_v9 = vld [vmem:[%s2794_s1 + $0x228] ss:$16 sps:$4 sm:$0xff]   ;;  %v1977_v10 = vld [vmem:[%s2794_s1 + $0x244] ss:$16 sps:$4 sm:$0xff]  }
  0x1a   :  { %v1980_v11 = vld [vmem:[%s2794_s1 + $0x24c] ss:$16 sps:$4 sm:$0xff]   ;;  %v1975_v12 = vld [vmem:[%s2794_s1 + $0x240] ss:$16 sps:$4 sm:$0xff]   ;;  %v1978_v13 = vld [vmem:[%s2794_s1 + $0x248] ss:$16 sps:$4 sm:$0xff]  }
  0x1b   :  { %1029 = vmatpush1.bf16.msra.mxu0 %v1904_v26  ;;  %1248 = vmatpush1.bf16.msra.mxu1 %v1905_v27  ;;  %v2023_v14 = vld [vmem:[%s2795_s0 + $0x2c] ss:$20 sps:$4 sm:$0xff]   ;;  %v2025_v15 = vld [vmem:[%s2795_s0 + $0x28] ss:$20 sps:$4 sm:$0xff]   ;;  %v1983_v16 = vld [vmem:[%s2794_s1 + $0x264] ss:$16 sps:$4 sm:$0xff]  }
  0x1c   :  { %1030 = vmatprep.subr.bf16.mxu0 %v1906_v28  ;;  %1249 = vmatprep.subr.bf16.mxu1 %v1908_v29  ;;  %v1986_v17 = vld [vmem:[%s2794_s1 + $0x26c] ss:$16 sps:$4 sm:$0xff]   ;;  %v1981_v18 = vld [vmem:[%s2794_s1 + $0x260] ss:$16 sps:$4 sm:$0xff]   ;;  %v1984_v19 = vld [vmem:[%s2794_s1 + $0x268] ss:$16 sps:$4 sm:$0xff]  }
  0x1d   :  { %v1989_v20 = vld [vmem:[%s2794_s1 + $0x284] ss:$16 sps:$4 sm:$0xff]   ;;  %v1992_v21 = vld [vmem:[%s2794_s1 + $0x28c] ss:$16 sps:$4 sm:$0xff]   ;;  %v1987_v22 = vld [vmem:[%s2794_s1 + $0x280] ss:$16 sps:$4 sm:$0xff]  }
  0x1e   :  { %v2038_v23 = vld [vmem:[%s2795_s0 + $0x54] ss:$20 sps:$4 sm:$0xff]   ;;  %v2040_v25 = vld [vmem:[%s2795_s0 + $0x50] ss:$20 sps:$4 sm:$0xff]   ;;  %v1998_v27 = vld [vmem:[%s2794_s1 + $0x2ac] ss:$16 sps:$4 sm:$0xff]  }
  0x1f   :  { %1031 = vmatpush1.bf16.msra.mxu0 %v1910_v30  ;;  %1250 = vmatpush1.bf16.msra.mxu1 %v1911_v31  ;;  %v1990_v24 = vld [vmem:[%s2794_s1 + $0x288] ss:$16 sps:$4 sm:$0xff]   ;;  %v1995_v26 = vld [vmem:[%s2794_s1 + $0x2a4] ss:$16 sps:$4 sm:$0xff]   ;;  %v1993_v28 = vld [vmem:[%s2794_s1 + $0x2a0] ss:$16 sps:$4 sm:$0xff]  }
  0x20   :  { %1032 = vmatprep.subr.bf16.mxu0 %v1912_v32  ;;  %1251 = vmatprep.subr.bf16.mxu1 %v1914_v33  ;;  %v1996_v29 = vld [vmem:[%s2794_s1 + $0x2a8] ss:$16 sps:$4 sm:$0xff]   ;;  %v2001_v30 = vld [vmem:[%s2794_s1 + $0x2c4] ss:$16 sps:$4 sm:$0xff]   ;;  %v2053_v31 = vld [vmem:[%s2795_s0 + $0x7c] ss:$20 sps:$4 sm:$0xff]  }
  0x21   :  { %v2004_v32 = vld [vmem:[%s2794_s1 + $0x2cc] ss:$16 sps:$4 sm:$0xff]   ;;  %v1999_v33 = vld [vmem:[%s2794_s1 + $0x2c0] ss:$16 sps:$4 sm:$0xff]   ;;  %v2020_v48 = vld [vmem:[%s2794_s1 + $0x328] ss:$16 sps:$4 sm:$0xff]  }
  0x23   :  { %1033 = vmatpush1.bf16.msra.mxu0 %v1916_v34  ;;  %1252 = vmatpush1.bf16.msra.mxu1 %v1917_v35  ;;  %v2002_v34 = vld [vmem:[%s2794_s1 + $0x2c8] ss:$16 sps:$4 sm:$0xff]  }
  0x24   :  { %1034 = vmatprep.subr.bf16.mxu0 %v1918_v36  ;;  %1253 = vmatprep.subr.bf16.mxu1 %v1920_v37  ;;  %v2055_v35 = vld [vmem:[%s2795_s0 + $0x78] ss:$20 sps:$4 sm:$0xff]   ;;  %v2007_v36 = vld [vmem:[%s2794_s1 + $0x2e4] ss:$16 sps:$4 sm:$0xff]  }
  0x25   :  { %v2010_v37 = vld [vmem:[%s2794_s1 + $0x2ec] ss:$16 sps:$4 sm:$0xff]  }
  0x27   :  { %1035 = vmatpush1.bf16.msra.mxu0 %v1922_v38  ;;  %1254 = vmatpush1.bf16.msra.mxu1 %v1923_v39  ;;  %v2005_v38 = vld [vmem:[%s2794_s1 + $0x2e0] ss:$16 sps:$4 sm:$0xff]   ;;  %v2008_v39 = vld [vmem:[%s2794_s1 + $0x2e8] ss:$16 sps:$4 sm:$0xff]  }
  0x28   :  { %1036 = vmatprep.subr.bf16.mxu0 %v1924_v40  ;;  %1255 = vmatprep.subr.bf16.mxu1 %v1926_v41  ;;  %v2070_v40 = vld [vmem:[%s2795_s0 + $0xc] ss:$20 sps:$4 sm:$0xff]   ;;  %v2013_v41 = vld [vmem:[%s2794_s1 + $0x304] ss:$16 sps:$4 sm:$0xff]  }
  0x2b   :  { %1037 = vmatpush1.bf16.msra.mxu0 %v1928_v42  ;;  %1256 = vmatpush1.bf16.msra.mxu1 %v1929_v43  ;;  %v2016_v42 = vld [vmem:[%s2794_s1 + $0x30c] ss:$16 sps:$4 sm:$0xff]   ;;  %v2011_v43 = vld [vmem:[%s2794_s1 + $0x300] ss:$16 sps:$4 sm:$0xff]  }
  0x2c   :  { %1038 = vmatprep.subr.bf16.mxu0 %v1930_v44  ;;  %1257 = vmatprep.subr.bf16.mxu1 %v1932_v45  ;;  %v2014_v44 = vld [vmem:[%s2794_s1 + $0x308] ss:$16 sps:$4 sm:$0xff]   ;;  %v2019_v45 = vld [vmem:[%s2794_s1 + $0x324] ss:$16 sps:$4 sm:$0xff]  }
  0x2f   :  { %1039 = vmatpush1.bf16.msra.mxu0 %v1934_v46  ;;  %1258 = vmatpush1.bf16.msra.mxu1 %v1935_v47  ;;  %v2022_v46 = vld [vmem:[%s2794_s1 + $0x32c] ss:$16 sps:$4 sm:$0xff]   ;;  %v2017_v47 = vld [vmem:[%s2794_s1 + $0x320] ss:$16 sps:$4 sm:$0xff]  }
  0x30   :  { %1040 = vmatprep.subr.bf16.mxu0 %v1936_v49  ;;  %1259 = vmatprep.subr.bf16.mxu1 %v1938_v50  ;;  %v2028_v49 = vld [vmem:[%s2794_s1 + $0x344] ss:$16 sps:$4 sm:$0xff]   ;;  %v2031_v50 = vld [vmem:[%s2794_s1 + $0x34c] ss:$16 sps:$4 sm:$0xff]  }
  0x33   :  { %1041 = vmatpush1.bf16.msra.mxu0 %v1940_v51  ;;  %1260 = vmatpush1.bf16.msra.mxu1 %v1941_v52  ;;  %v2026_v51 = vld [vmem:[%s2794_s1 + $0x340] ss:$16 sps:$4 sm:$0xff]   ;;  %v2029_v52 = vld [vmem:[%s2794_s1 + $0x348] ss:$16 sps:$4 sm:$0xff]  }
  0x34   :  { %1042 = vmatprep.subr.bf16.mxu0 %v1942_v53  ;;  %1261 = vmatprep.subr.bf16.mxu1 %v1944_v54  ;;  %v2034_v53 = vld [vmem:[%s2794_s1 + $0x364] ss:$16 sps:$4 sm:$0xff]   ;;  %v2037_v54 = vld [vmem:[%s2794_s1 + $0x36c] ss:$16 sps:$4 sm:$0xff]  }
  0x37   :  { %1043 = vmatpush1.bf16.msra.mxu0 %v1946_v55  ;;  %1262 = vmatpush1.bf16.msra.mxu1 %v1947_v56  ;;  %v2032_v55 = vld [vmem:[%s2794_s1 + $0x360] ss:$16 sps:$4 sm:$0xff]   ;;  %v2035_v56 = vld [vmem:[%s2794_s1 + $0x368] ss:$16 sps:$4 sm:$0xff]  }
  0x38   :  { %1044 = vmatprep.subr.bf16.mxu0 %v1948_v57  ;;  %1263 = vmatprep.subr.bf16.mxu1 %v1950_v58  ;;  %v2043_v57 = vld [vmem:[%s2794_s1 + $0x384] ss:$16 sps:$4 sm:$0xff]   ;;  %v2046_v58 = vld [vmem:[%s2794_s1 + $0x38c] ss:$16 sps:$4 sm:$0xff]  }
  0x3b   :  { %1045 = vmatpush1.bf16.msra.mxu0 %v1952_v59  ;;  %1264 = vmatpush1.bf16.msra.mxu1 %v1953_v60  ;;  %v2041_v59 = vld [vmem:[%s2794_s1 + $0x380] ss:$16 sps:$4 sm:$0xff]   ;;  %v2044_v60 = vld [vmem:[%s2794_s1 + $0x388] ss:$16 sps:$4 sm:$0xff]  }
  0x3c   :  { %1046 = vmatprep.subr.bf16.mxu0 %v1954_v61  ;;  %1265 = vmatprep.subr.bf16.mxu1 %v1956_v62  ;;  %v2049_v61 = vld [vmem:[%s2794_s1 + $0x3a4] ss:$16 sps:$4 sm:$0xff]   ;;  %v2052_v62 = vld [vmem:[%s2794_s1 + $0x3ac] ss:$16 sps:$4 sm:$0xff]  }
  0x3f   :  { %1047 = vmatpush1.bf16.msra.mxu0 %v1958_v63  ;;  %1266 = vmatpush1.bf16.msra.mxu1 %v1959_v0  ;;  %v2047_v63 = vld [vmem:[%s2794_s1 + $0x3a0] ss:$16 sps:$4 sm:$0xff]   ;;  %v2050_v0 = vld [vmem:[%s2794_s1 + $0x3a8] ss:$16 sps:$4 sm:$0xff]  }
  0x40   :  { %1089 = vmatprep.subr.bf16.mxu0 %v1965_v1  ;;  %1308 = vmatprep.subr.bf16.mxu1 %v1968_v2  ;;  %v2058_v1 = vld [vmem:[%s2794_s1 + $0x3c4] ss:$16 sps:$4 sm:$0xff]   ;;  %v2061_v2 = vld [vmem:[%s2794_s1 + $0x3cc] ss:$16 sps:$4 sm:$0xff]  }
  0x42   :  { %1049 = vmatmul.mubr.bf16.vlgmr.msra.gmra.mrb[0].mxu0 %v1960_v3  ;;  %1268 = vmatmul.mubr.bf16.vlgmr.msra.gmra.mrb[0].mxu1 %v1960_v3  ;;  %v2056_v3 = vld [vmem:[%s2794_s1 + $0x3c0] ss:$16 sps:$4 sm:$0xff]  }
  0x43   :  { %1090 = vmatpush1.bf16.msra.mxu0 %v1963_v4  ;;  %1309 = vmatpush1.bf16.msra.mxu1 %v1966_v5  ;;  %v2059_v4 = vld [vmem:[%s2794_s1 + $0x3c8] ss:$16 sps:$4 sm:$0xff]   ;;  %v2064_v5 = vld [vmem:[%s2794_s1 + $0x3e4] ss:$16 sps:$4 sm:$0xff]  }
  0x44   :  { %1091 = vmatprep.subr.bf16.mxu0 %v1971_v6  ;;  %1310 = vmatprep.subr.bf16.mxu1 %v1974_v7  ;;  %v2067_v6 = vld [vmem:[%s2794_s1 + $0x3ec] ss:$16 sps:$4 sm:$0xff]   ;;  %v2062_v7 = vld [vmem:[%s2794_s1 + $0x3e0] ss:$16 sps:$4 sm:$0xff]  }
  0x45   :  { %1058 = vmatprep.mubr.bf16.mxu0 %v2023_v14  ;;  %1277 = vmatprep.mubr.bf16.mxu1 %v2023_v14  ;;  %v2077_v14 = vld [vmem:[%s2795_s0 + $0x34] ss:$20 sps:$4 sm:$0xff]  }
  0x47   :  { %1092 = vmatpush1.bf16.msra.mxu0 %v1969_v8  ;;  %1311 = vmatpush1.bf16.msra.mxu1 %v1972_v9  ;;  %v2065_v8 = vld [vmem:[%s2794_s1 + $0x3e8] ss:$16 sps:$4 sm:$0xff]   ;;  %v2073_v9 = vld [vmem:[%s2794_s1 + $0x404] ss:$16 sps:$4 sm:$0xff]  }
  0x48   :  { %1093 = vmatprep.subr.bf16.mxu0 %v1977_v10  ;;  %1312 = vmatprep.subr.bf16.mxu1 %v1980_v11  ;;  %v2076_v10 = vld [vmem:[%s2794_s1 + $0x40c] ss:$16 sps:$4 sm:$0xff]  }
  0x49   :  { %v2068_v11 = vld [vmem:[%s2795_s0 + $0x8] ss:$20 sps:$4 sm:$0xff]  }
  0x4a   :  { %1059 = vmatmul.mubr.bf16.gmra.mrb[4].mxu0 %v2025_v15  ;;  %1278 = vmatmul.mubr.bf16.gmra.mrb[4].mxu1 %v2025_v15  ;;  %v2082_v15 = vld [vmem:[%s2794_s1 + $0x424] ss:$16 sps:$4 sm:$0xff]  }
  0x4b   :  { %1094 = vmatpush1.bf16.msra.mxu0 %v1975_v12  ;;  %1313 = vmatpush1.bf16.msra.mxu1 %v1978_v13  ;;  %v2071_v12 = vld [vmem:[%s2794_s1 + $0x400] ss:$16 sps:$4 sm:$0xff]   ;;  %v2074_v13 = vld [vmem:[%s2794_s1 + $0x408] ss:$16 sps:$4 sm:$0xff]  }
  0x4c   :  { %1095 = vmatprep.subr.bf16.mxu0 %v1983_v16  ;;  %1314 = vmatprep.subr.bf16.mxu1 %v1986_v17  ;;  %v2085_v16 = vld [vmem:[%s2794_s1 + $0x42c] ss:$16 sps:$4 sm:$0xff]   ;;  %v2080_v17 = vld [vmem:[%s2794_s1 + $0x420] ss:$16 sps:$4 sm:$0xff]  }
  0x4d   :  { %1068 = vmatprep.mubr.bf16.mxu0 %v2038_v23  ;;  %1287 = vmatprep.mubr.bf16.mxu1 %v2038_v23  ;;  %v2089_v23 = vld [vmem:[%s2794_s1 + $0x440] ss:$16 sps:$4 sm:$0xff]  }
  0x4f   :  { %1096 = vmatpush1.bf16.msra.mxu0 %v1981_v18  ;;  %1315 = vmatpush1.bf16.msra.mxu1 %v1984_v19  ;;  %v2083_v18 = vld [vmem:[%s2794_s1 + $0x428] ss:$16 sps:$4 sm:$0xff]   ;;  %v2091_v19 = vld [vmem:[%s2794_s1 + $0x444] ss:$16 sps:$4 sm:$0xff]  }
  0x50   :  { %1097 = vmatprep.subr.bf16.mxu0 %v1989_v20  ;;  %1316 = vmatprep.subr.bf16.mxu1 %v1992_v21  ;;  %v2094_v20 = vld [vmem:[%s2794_s1 + $0x44c] ss:$16 sps:$4 sm:$0xff]   ;;  %v2079_v21 = vld [vmem:[%s2795_s0 + $0x30] ss:$20 sps:$4 sm:$0xff]  }
  0x52   :  { %1069 = vmatmul.mubr.bf16.gmra.mrb[8].mxu0 %v2040_v25  ;;  %1288 = vmatmul.mubr.bf16.gmra.mrb[8].mxu1 %v2040_v25  ;;  %v2100_v25 = vld [vmem:[%s2794_s1 + $0x464] ss:$16 sps:$4 sm:$0xff]  }
  0x53   :  { %1098 = vmatpush1.bf16.msra.mxu0 %v1987_v22  ;;  %1317 = vmatpush1.bf16.msra.mxu1 %v1990_v24  ;;  %v2086_v22 = vld [vmem:[%s2795_s0 + $0x5c] ss:$20 sps:$4 sm:$0xff]   ;;  %v2092_v24 = vld [vmem:[%s2794_s1 + $0x448] ss:$16 sps:$4 sm:$0xff]  }
  0x54   :  { %1099 = vmatprep.subr.bf16.mxu0 %v1995_v26  ;;  %1318 = vmatprep.subr.bf16.mxu1 %v1998_v27  ;;  %v2103_v26 = vld [vmem:[%s2794_s1 + $0x46c] ss:$16 sps:$4 sm:$0xff]   ;;  %v2098_v27 = vld [vmem:[%s2794_s1 + $0x460] ss:$16 sps:$4 sm:$0xff]  }
  0x55   :  { %1078 = vmatprep.mubr.bf16.mxu0 %v2053_v31  ;;  %1297 = vmatprep.mubr.bf16.mxu1 %v2053_v31  ;;  %v2097_v31 = vld [vmem:[%s2795_s0 + $0x80] ss:$20 sps:$4 sm:$0xff]  }
  0x57   :  { %1100 = vmatpush1.bf16.msra.mxu0 %v1993_v28  ;;  %1319 = vmatpush1.bf16.msra.mxu1 %v1996_v29  ;;  %v2101_v28 = vld [vmem:[%s2794_s1 + $0x468] ss:$16 sps:$4 sm:$0xff]  }
  0x58   :  { %1101 = vmatprep.subr.bf16.mxu0 %v2001_v30  ;;  %1320 = vmatprep.subr.bf16.mxu1 %v2004_v32  ;;  %v2088_v29 = vld [vmem:[%s2795_s0 + $0x58] ss:$20 sps:$4 sm:$0xff]   ;;  %v2108_v32 = vmov 0  }
  0x59   :  { %v2095_v30 = vld [vmem:[%s2795_s0 + $0x84] ss:$20 sps:$4 sm:$0xff]  }
  0x5a   :  { %1079 = vmatmul.mubr.bf16.gmra.mrb[12].mxu0 %v2055_v35  ;;  %1298 = vmatmul.mubr.bf16.gmra.mrb[12].mxu1 %v2055_v35  ;;  %v2106_v35 = vld [vmem:[%s2795_s0 + $0x60] ss:$20 sps:$4 sm:$0xff]  }
  0x5b   :  { %1102 = vmatpush1.bf16.msra.mxu0 %v1999_v33  ;;  %1321 = vmatpush1.bf16.msra.mxu1 %v2002_v34  ;;  %v2104_v33 = vld [vmem:[%s2795_s0 + $0x10] ss:$20 sps:$4 sm:$0xff]   ;;  %v2105_v34 = vld [vmem:[%s2795_s0 + $0x38] ss:$20 sps:$4 sm:$0xff]  }
  0x5c   :  { %1103 = vmatprep.subr.bf16.mxu0 %v2007_v36  ;;  %1322 = vmatprep.subr.bf16.mxu1 %v2010_v37  ;;  %v2107_v36 = vld [vmem:[%s2795_s0 + $0x88] ss:$20 sps:$4 sm:$0xff]  }
  0x5d   :  { %1121 = vmatprep.mubr.bf16.mxu0 %v2070_v40  ;;  %1340 = vmatprep.mubr.bf16.mxu1 %v2070_v40 }
  0x5f   :  { %1104 = vmatpush1.bf16.msra.mxu0 %v2005_v38  ;;  %1323 = vmatpush1.bf16.msra.mxu1 %v2008_v39 }
  0x60   :  { %1105 = vmatprep.subr.bf16.mxu0 %v2013_v41  ;;  %1324 = vmatprep.subr.bf16.mxu1 %v2016_v42 }
  0x63   :  { %1106 = vmatpush1.bf16.msra.mxu0 %v2011_v43  ;;  %1325 = vmatpush1.bf16.msra.mxu1 %v2014_v44 }
  0x64   :  { %1107 = vmatprep.subr.bf16.mxu0 %v2019_v45  ;;  %1326 = vmatprep.subr.bf16.mxu1 %v2022_v46 }
  0x67   :  { %1108 = vmatpush1.bf16.msra.mxu0 %v2017_v47  ;;  %1327 = vmatpush1.bf16.msra.mxu1 %v2020_v48 }
  0x68   :  { %1109 = vmatprep.subr.bf16.mxu0 %v2028_v49  ;;  %1328 = vmatprep.subr.bf16.mxu1 %v2031_v50 }
  0x6b   :  { %1110 = vmatpush1.bf16.msra.mxu0 %v2026_v51  ;;  %1329 = vmatpush1.bf16.msra.mxu1 %v2029_v52 }
  0x6c   :  { %1111 = vmatprep.subr.bf16.mxu0 %v2034_v53  ;;  %1330 = vmatprep.subr.bf16.mxu1 %v2037_v54 }
  0x6f   :  { %1112 = vmatpush1.bf16.msra.mxu0 %v2032_v55  ;;  %1331 = vmatpush1.bf16.msra.mxu1 %v2035_v56 }
  0x70   :  { %1113 = vmatprep.subr.bf16.mxu0 %v2043_v57  ;;  %1332 = vmatprep.subr.bf16.mxu1 %v2046_v58 }
  0x73   :  { %1114 = vmatpush1.bf16.msra.mxu0 %v2041_v59  ;;  %1333 = vmatpush1.bf16.msra.mxu1 %v2044_v60 }
  0x74   :  { %1115 = vmatprep.subr.bf16.mxu0 %v2049_v61  ;;  %1334 = vmatprep.subr.bf16.mxu1 %v2052_v62 }
  0x77   :  { %1116 = vmatpush1.bf16.msra.mxu0 %v2047_v63  ;;  %1335 = vmatpush1.bf16.msra.mxu1 %v2050_v0 }
  0x78   :  { %1117 = vmatprep.subr.bf16.mxu0 %v2058_v1  ;;  %1336 = vmatprep.subr.bf16.mxu1 %v2061_v2 }
  0x7b   :  { %1118 = vmatpush1.bf16.msra.mxu0 %v2056_v3  ;;  %1337 = vmatpush1.bf16.msra.mxu1 %v2059_v4 }
  0x7c   :  { %1119 = vmatprep.subr.bf16.mxu0 %v2064_v5  ;;  %1338 = vmatprep.subr.bf16.mxu1 %v2067_v6 }
  0x7f   :  { %1120 = vmatpush1.bf16.msra.mxu0 %v2062_v7  ;;  %1339 = vmatpush1.bf16.msra.mxu1 %v2065_v8 }
  0x80   :  { %1162 = vmatprep.subr.bf16.mxu0 %v2073_v9  ;;  %1381 = vmatprep.subr.bf16.mxu1 %v2076_v10 }
  0x82   :  { %1122 = vmatmul.mubr.bf16.vlgmr.msra.gmra.mrb[0].mxu0 %v2068_v11  ;;  %1341 = vmatmul.mubr.bf16.vlgmr.msra.gmra.mrb[0].mxu1 %v2068_v11 }
  0x83   :  { %1163 = vmatpush1.bf16.msra.mxu0 %v2071_v12  ;;  %1382 = vmatpush1.bf16.msra.mxu1 %v2074_v13 }
  0x84   :  { %1131 = vmatprep.mubr.bf16.mxu0 %v2077_v14  ;;  %1350 = vmatprep.mubr.bf16.mxu1 %v2077_v14 }
  0x85   :  { %1164 = vmatprep.subr.bf16.mxu0 %v2082_v15  ;;  %1383 = vmatprep.subr.bf16.mxu1 %v2085_v16 }
  0x87   :  { %1165 = vmatpush1.bf16.msra.mxu0 %v2080_v17  ;;  %1384 = vmatpush1.bf16.msra.mxu1 %v2083_v18 }
  0x88   :  { %1166 = vmatprep.subr.bf16.mxu0 %v2091_v19  ;;  %1385 = vmatprep.subr.bf16.mxu1 %v2094_v20 }
  0x8a   :  { %1132 = vmatmul.mubr.bf16.gmra.mrb[4].mxu0 %v2079_v21  ;;  %1351 = vmatmul.mubr.bf16.gmra.mrb[4].mxu1 %v2079_v21 }
  0x8b   :  { %1141 = vmatprep.mubr.bf16.mxu0 %v2086_v22  ;;  %1360 = vmatprep.mubr.bf16.mxu1 %v2086_v22 }
  0x8c   :  { %1167 = vmatpush1.bf16.msra.mxu0 %v2089_v23  ;;  %1386 = vmatpush1.bf16.msra.mxu1 %v2092_v24 }
  0x8d   :  { %1168 = vmatprep.subr.bf16.mxu0 %v2100_v25  ;;  %1387 = vmatprep.subr.bf16.mxu1 %v2103_v26 }
  0x90   :  { %1169 = vmatpush1.bf16.msra.mxu0 %v2098_v27  ;;  %1388 = vmatpush1.bf16.msra.mxu1 %v2101_v28 }
  0x92   :  { %1142 = vmatmul.mubr.bf16.gmra.mrb[8].mxu0 %v2088_v29  ;;  %1361 = vmatmul.mubr.bf16.gmra.mrb[8].mxu1 %v2088_v29 }
  0x93   :  { %1151 = vmatprep.mubr.bf16.mxu0 %v2095_v30  ;;  %1370 = vmatprep.mubr.bf16.mxu1 %v2095_v30 }
  0x9a   :  { %1152 = vmatmul.mubr.bf16.gmra.mrb[12].mxu0 %v2097_v31  ;;  %1371 = vmatmul.mubr.bf16.gmra.mrb[12].mxu1 %v2097_v31 }
  0x9b   :  { %1194 = vmatprep.mubr.bf16.mxu0 %v2108_v32  ;;  %1413 = vmatprep.mubr.bf16.mxu1 %v2108_v32 }
  0xa2   :  { %1791 = vmatmul.mubr.msk.bf16.vlgmr.msra.gmra.mrb[0].mxu0 %vm1003_vm0, %v2104_v33  ;;  %1795 = vmatmul.mubr.msk.bf16.vlgmr.msra.gmra.mrb[0].mxu1 %vm1003_vm0, %v2104_v33 }
  0xa3   :  { %1204 = vmatprep.mubr.bf16.mxu0 %v2108_v32  ;;  %1423 = vmatprep.mubr.bf16.mxu1 %v2108_v32 }
  0xaa   :  { %1792 = vmatmul.mubr.msk.bf16.gmra.mrb[4].mxu0 %vm1003_vm0, %v2105_v34  ;;  %1796 = vmatmul.mubr.msk.bf16.gmra.mrb[4].mxu1 %vm1003_vm0, %v2105_v34 }
  0xab   :  { %1214 = vmatprep.mubr.bf16.mxu0 %v2108_v32  ;;  %1433 = vmatprep.mubr.bf16.mxu1 %v2108_v32 }
  0xb2   :  { %1793 = vmatmul.mubr.msk.bf16.gmra.mrb[8].mxu0 %vm1003_vm0, %v2106_v35  ;;  %1797 = vmatmul.mubr.msk.bf16.gmra.mrb[8].mxu1 %vm1003_vm0, %v2106_v35 }
  0xb3   :  { %1224 = vmatprep.mubr.bf16.mxu0 %v2108_v32  ;;  %1443 = vmatprep.mubr.bf16.mxu1 %v2108_v32 }
  0xba   :  { %1794 = vmatmul.mubr.msk.bf16.gmra.mrb[12].mxu0 %vm1003_vm0, %v2107_v36  ;;  %1798 = vmatmul.mubr.msk.bf16.gmra.mrb[12].mxu1 %vm1003_vm0, %v2107_v36 }
 0x175   :  { %v1196_v37 = vpop.f32.mrb[0].mxu0  ;;  %v1415_v38 = vpop.f32.mrb[0].mxu1 }
 0x176   :  { %1454 = vst [vmem:[%s2796_s2] sm:$0xff] %v1196_v37  ;;  %v1535_v39 = vmul.f32 %v1196_v37, %v1196_v37  ;;  %1456 = vst [vmem:[%s2796_s2 + $0x10] sm:$0xff] %v1415_v38  ;;  %v1198_v40 = vpop.f32.mrb[1].mxu0  ;;  %v1417_v41 = vpop.f32.mrb[1].mxu1  ;;  %v1537_v52 = vmul.f32 %v1415_v38, %v1415_v38 }
 0x177   :  { %1455 = vst [vmem:[%s2796_s2 + $0x8] sm:$0xff] %v1198_v40  ;;  %v1486_v42 = vadd.f32 %v1198_v40, %v1196_v37  ;;  %v1536_v43 = vmul.f32 %v1198_v40, %v1198_v40  ;;  %1457 = vst [vmem:[%s2796_s2 + $0x18] sm:$0xff] %v1417_v41  ;;  %v1200_v44 = vpop.f32.mrb[2].mxu0  ;;  %v1419_v45 = vpop.f32.mrb[2].mxu1  ;;  %v1538_v58 = vmul.f32 %v1417_v41, %v1417_v41 }
 0x178   :  { %1458 = vst [vmem:[%s2796_s2 + $0x20] sm:$0xff] %v1200_v44  ;;  %v1539_v46 = vmul.f32 %v1200_v44, %v1200_v44  ;;  %1460 = vst [vmem:[%s2796_s2 + $0x30] sm:$0xff] %v1419_v45  ;;  %v1202_v47 = vpop.f32.mrb[3].mxu0  ;;  %v1421_v48 = vpop.f32.mrb[3].mxu1  ;;  %v1541_v54 = vmul.f32 %v1419_v45, %v1419_v45 }
 0x179   :  { %1459 = vst [vmem:[%s2796_s2 + $0x28] sm:$0xff] %v1202_v47  ;;  %v1491_v49 = vadd.f32 %v1202_v47, %v1200_v44  ;;  %v1540_v50 = vmul.f32 %v1202_v47, %v1202_v47  ;;  %1461 = vst [vmem:[%s2796_s2 + $0x38] sm:$0xff] %v1421_v48  ;;  %v1487_v51 = vadd.f32 %v1486_v42, %v1415_v38 }
 0x17a   :  { %v1567_v53 = vadd.f32 %v1536_v43, %v1535_v39  ;;  %v1542_v62 = vmul.f32 %v1421_v48, %v1421_v48 }
 0x17b   :  { %v1488_v55 = vadd.f32 %v1487_v51, %v1417_v41  ;;  %v1572_v56 = vadd.f32 %v1540_v50, %v1539_v46  ;;  %v1492_v57 = vadd.f32 %v1491_v49, %v1419_v45 }
 0x17c   :  { %v1568_v59 = vadd.f32 %v1567_v53, %v1537_v52 }
 0x17d   :  { %v1425_v60 = vpop.f32.mrb[4].mxu1  ;;  %1489 = vadd.xlane.f32.xlu0 %v1488_v55  ;;  %v1206_v61 = vpop.f32.mrb[4].mxu0  ;;  %v1573_v63 = vadd.f32 %v1572_v56, %v1541_v54  ;;  %v1493_v0 = vadd.f32 %v1492_v57, %v1421_v48 }
 0x17e   :  { %1464 = vst [vmem:[%s2796_s2 + $0x50] sm:$0xff] %v1425_v60  ;;  %1462 = vst [vmem:[%s2796_s2 + $0x40] sm:$0xff] %v1206_v61  ;;  %v1543_v1 = vmul.f32 %v1206_v61, %v1206_v61  ;;  %v1208_v2 = vpop.f32.mrb[5].mxu0  ;;  %v1427_v3 = vpop.f32.mrb[5].mxu1  ;;  %v1569_v4 = vadd.f32 %v1568_v59, %v1538_v58  ;;  %v1545_v16 = vmul.f32 %v1425_v60, %v1425_v60 }
 0x17f   :  { %1463 = vst [vmem:[%s2796_s2 + $0x48] sm:$0xff] %v1208_v2  ;;  %v1496_v5 = vadd.f32 %v1208_v2, %v1206_v61  ;;  %v1544_v6 = vmul.f32 %v1208_v2, %v1208_v2  ;;  %1465 = vst [vmem:[%s2796_s2 + $0x58] sm:$0xff] %v1427_v3  ;;  %v1210_v7 = vpop.f32.mrb[6].mxu0  ;;  %v1429_v8 = vpop.f32.mrb[6].mxu1  ;;  %v1574_v9 = vadd.f32 %v1573_v63, %v1542_v62 }
 0x180   :  { %1466 = vst [vmem:[%s2796_s2 + $0x60] sm:$0xff] %v1210_v7  ;;  %v1547_v10 = vmul.f32 %v1210_v7, %v1210_v7  ;;  %1468 = vst [vmem:[%s2796_s2 + $0x70] sm:$0xff] %v1429_v8  ;;  %v1212_v11 = vpop.f32.mrb[7].mxu0  ;;  %v1431_v12 = vpop.f32.mrb[7].mxu1  ;;  %v1549_v18 = vmul.f32 %v1429_v8, %v1429_v8  ;;  %v1546_v22 = vmul.f32 %v1427_v3, %v1427_v3 }
 0x181   :  { %1467 = vst [vmem:[%s2796_s2 + $0x68] sm:$0xff] %v1212_v11  ;;  %v1501_v13 = vadd.f32 %v1212_v11, %v1210_v7  ;;  %v1548_v14 = vmul.f32 %v1212_v11, %v1212_v11  ;;  %1469 = vst [vmem:[%s2796_s2 + $0x78] sm:$0xff] %v1431_v12  ;;  %1575 = vadd.xlane.f32.xlu1 %v1574_v9  ;;  %1494 = vadd.xlane.f32.xlu0 %v1493_v0 }
 0x182   :  { %v1497_v15 = vadd.f32 %v1496_v5, %v1425_v60  ;;  %v1577_v17 = vadd.f32 %v1544_v6, %v1543_v1  ;;  %v1550_v27 = vmul.f32 %v1431_v12, %v1431_v12 }
 0x183   :  { %v1502_v20 = vadd.f32 %v1501_v13, %v1429_v8  ;;  %v1582_v21 = vadd.f32 %v1548_v14, %v1547_v10 }
 0x184   :  { %v1498_v19 = vadd.f32 %v1497_v15, %v1427_v3  ;;  %v1578_v23 = vadd.f32 %v1577_v17, %v1545_v16 }
 0x185   :  { %v1435_v24 = vpop.f32.mrb[8].mxu1  ;;  %1570 = vadd.xlane.f32.xlu0 %v1569_v4  ;;  %v1216_v25 = vpop.f32.mrb[8].mxu0  ;;  %v1503_v26 = vadd.f32 %v1502_v20, %v1431_v12  ;;  %v1583_v28 = vadd.f32 %v1582_v21, %v1549_v18 }
 0x186   :  { %1499 = vadd.xlane.f32.xlu1 %v1498_v19  ;;  %1472 = vst [vmem:[%s2796_s2 + $0x90] sm:$0xff] %v1435_v24  ;;  %1470 = vst [vmem:[%s2796_s2 + $0x80] sm:$0xff] %v1216_v25  ;;  %v1551_v29 = vmul.f32 %v1216_v25, %v1216_v25  ;;  %v1218_v30 = vpop.f32.mrb[9].mxu0  ;;  %v1437_v31 = vpop.f32.mrb[9].mxu1  ;;  %v1579_v32 = vadd.f32 %v1578_v23, %v1546_v22  ;;  %v1553_v44 = vmul.f32 %v1435_v24, %v1435_v24 }
 0x187   :  { %1471 = vst [vmem:[%s2796_s2 + $0x88] sm:$0xff] %v1218_v30  ;;  %v1506_v33 = vadd.f32 %v1218_v30, %v1216_v25  ;;  %v1552_v34 = vmul.f32 %v1218_v30, %v1218_v30  ;;  %1473 = vst [vmem:[%s2796_s2 + $0x98] sm:$0xff] %v1437_v31  ;;  %v1220_v35 = vpop.f32.mrb[10].mxu0  ;;  %v1439_v36 = vpop.f32.mrb[10].mxu1  ;;  %v1584_v37 = vadd.f32 %v1583_v28, %v1550_v27 }
 0x188   :  { %1474 = vst [vmem:[%s2796_s2 + $0xa0] sm:$0xff] %v1220_v35  ;;  %v1555_v38 = vmul.f32 %v1220_v35, %v1220_v35  ;;  %1476 = vst [vmem:[%s2796_s2 + $0xb0] sm:$0xff] %v1439_v36  ;;  %v1222_v39 = vpop.f32.mrb[11].mxu0  ;;  %v1441_v40 = vpop.f32.mrb[11].mxu1  ;;  %v1557_v46 = vmul.f32 %v1439_v36, %v1439_v36  ;;  %v1554_v50 = vmul.f32 %v1437_v31, %v1437_v31 }
 0x189   :  { %1475 = vst [vmem:[%s2796_s2 + $0xa8] sm:$0xff] %v1222_v39  ;;  %v1511_v41 = vadd.f32 %v1222_v39, %v1220_v35  ;;  %v1556_v42 = vmul.f32 %v1222_v39, %v1222_v39  ;;  %1477 = vst [vmem:[%s2796_s2 + $0xb8] sm:$0xff] %v1441_v40  ;;  %1580 = vadd.xlane.f32.xlu0 %v1579_v32  ;;  %v1507_v43 = vadd.f32 %v1506_v33, %v1435_v24 }
 0x18a   :  { %1504 = vadd.xlane.f32.xlu1 %v1503_v26  ;;  %v1587_v45 = vadd.f32 %v1552_v34, %v1551_v29  ;;  %v1558_v55 = vmul.f32 %v1441_v40, %v1441_v40 }
 0x18b   :  { %v1508_v47 = vadd.f32 %v1507_v43, %v1437_v31  ;;  %v1512_v48 = vadd.f32 %v1511_v41, %v1439_v36  ;;  %v1592_v49 = vadd.f32 %v1556_v42, %v1555_v38 }
 0x18c   :  { %v1588_v51 = vadd.f32 %v1587_v45, %v1553_v44 }
 0x18d   :  { %v1445_v52 = vpop.f32.mrb[12].mxu1  ;;  %1509 = vadd.xlane.f32.xlu0 %v1508_v47  ;;  %v1226_v53 = vpop.f32.mrb[12].mxu0  ;;  %v1513_v54 = vadd.f32 %v1512_v48, %v1441_v40  ;;  %v1593_v56 = vadd.f32 %v1592_v49, %v1557_v46 }
 0x18e   :  { %1585 = vadd.xlane.f32.xlu1 %v1584_v37  ;;  %1480 = vst [vmem:[%s2796_s2 + $0xd0] sm:$0xff] %v1445_v52  ;;  %1478 = vst [vmem:[%s2796_s2 + $0xc0] sm:$0xff] %v1226_v53  ;;  %v1559_v57 = vmul.f32 %v1226_v53, %v1226_v53  ;;  %v1228_v58 = vpop.f32.mrb[13].mxu0  ;;  %v1447_v59 = vpop.f32.mrb[13].mxu1  ;;  %v1589_v60 = vadd.f32 %v1588_v51, %v1554_v50  ;;  %v1561_v7 = vmul.f32 %v1445_v52, %v1445_v52 }
 0x18f   :  { %1479 = vst [vmem:[%s2796_s2 + $0xc8] sm:$0xff] %v1228_v58  ;;  %v1516_v61 = vadd.f32 %v1228_v58, %v1226_v53  ;;  %v1560_v62 = vmul.f32 %v1228_v58, %v1228_v58  ;;  %1481 = vst [vmem:[%s2796_s2 + $0xd8] sm:$0xff] %v1447_v59  ;;  %v1230_v63 = vpop.f32.mrb[14].mxu0  ;;  %v1449_v0 = vpop.f32.mrb[14].mxu1  ;;  %v1594_v1 = vadd.f32 %v1593_v56, %v1558_v55 }
 0x190   :  { %1482 = vst [vmem:[%s2796_s2 + $0xe0] sm:$0xff] %v1230_v63  ;;  %v1563_v2 = vmul.f32 %v1230_v63, %v1230_v63  ;;  %1484 = vst [vmem:[%s2796_s2 + $0xf0] sm:$0xff] %v1449_v0  ;;  %v1232_v3 = vpop.f32.mrb[15].mxu0  ;;  %v1451_v4 = vpop.f32.mrb[15].mxu1  ;;  %v1565_v10 = vmul.f32 %v1449_v0, %v1449_v0  ;;  %v1562_v14 = vmul.f32 %v1447_v59, %v1447_v59 }
 0x191   :  { %1483 = vst [vmem:[%s2796_s2 + $0xe8] sm:$0xff] %v1232_v3  ;;  %v1521_v5 = vadd.f32 %v1232_v3, %v1230_v63  ;;  %v1564_v6 = vmul.f32 %v1232_v3, %v1232_v3  ;;  %1485 = vst [vmem:[%s2796_s2 + $0xf8] sm:$0xff] %v1451_v4  ;;  %1590 = vadd.xlane.f32.xlu0 %v1589_v60  ;;  %v1517_v8 = vadd.f32 %v1516_v61, %v1445_v52 }
 0x192   :  { %1514 = vadd.xlane.f32.xlu1 %v1513_v54  ;;  %v1597_v9 = vadd.f32 %v1560_v62, %v1559_v57  ;;  %v1566_v16 = vmul.f32 %v1451_v4, %v1451_v4 }
 0x193   :  { %v1602_v11 = vadd.f32 %v1564_v6, %v1563_v2  ;;  %v1522_v12 = vadd.f32 %v1521_v5, %v1449_v0  ;;  %v1518_v13 = vadd.f32 %v1517_v8, %v1447_v59 }
 0x194   :  { %v1598_v15 = vadd.f32 %v1597_v9, %v1561_v7 }
 0x195   :  { %v1523_v17 = vadd.f32 %v1522_v12, %v1451_v4  ;;  %v1603_v18 = vadd.f32 %v1602_v11, %v1565_v10  ;;  %1519 = vadd.xlane.f32.xlu0 %v1518_v13 }
 0x196   :  { %1595 = vadd.xlane.f32.xlu1 %v1594_v1  ;;  %v1599_v19 = vadd.f32 %v1598_v15, %v1562_v14 }
 0x197   :  { %v1604_v20 = vadd.f32 %v1603_v18, %v1566_v16 }
 0x199   :  { %1600 = vadd.xlane.f32.xlu0 %v1599_v19 }
 0x19a   :  { %1524 = vadd.xlane.f32.xlu1 %v1523_v17 }
 0x19e   :  { %1605 = vadd.xlane.f32.xlu1 %v1604_v20 }
 0x20a   :  { %v1490_v21 = vpop.xlane.xlu0 %1489 }
 0x20b   :  { %1527 = vst.msk [vmem:[%s2797_s3] sm:$0xff] %vm1526_vm1, %v1490_v21 }
 0x20e   :  { %v1576_v22 = vpop.xlane.xlu1 %1575  ;;  %v1495_v23 = vpop.xlane.xlu0 %1494 }
 0x20f   :  { %1608 = vst.msk [vmem:[%s2798_s4 + $0x8] sm:$0xff] %vm1526_vm1, %v1576_v22  ;;  %1528 = vst.msk [vmem:[%s2797_s3 + $0x8] sm:$0xff] %vm1526_vm1, %v1495_v23 }
 0x212   :  { %v1571_v24 = vpop.xlane.xlu0 %1570 }
 0x213   :  { %v1500_v25 = vpop.xlane.xlu1 %1499  ;;  %1607 = vst.msk [vmem:[%s2798_s4] sm:$0xff] %vm1526_vm1, %v1571_v24 }
 0x214   :  { %1529 = vst.msk [vmem:[%s2797_s3 + $0x10] sm:$0xff] %vm1526_vm1, %v1500_v25 }
 0x216   :  { %v1581_v26 = vpop.xlane.xlu0 %1580 }
 0x217   :  { %v1505_v27 = vpop.xlane.xlu1 %1504  ;;  %1609 = vst.msk [vmem:[%s2798_s4 + $0x10] sm:$0xff] %vm1526_vm1, %v1581_v26 }
 0x218   :  { %1530 = vst.msk [vmem:[%s2797_s3 + $0x18] sm:$0xff] %vm1526_vm1, %v1505_v27 }
 0x21a   :  { %v1510_v29 = vpop.xlane.xlu0 %1509 }
 0x21b   :  { %v1586_v28 = vpop.xlane.xlu1 %1585  ;;  %1531 = vst.msk [vmem:[%s2797_s3 + $0x20] sm:$0xff] %vm1526_vm1, %v1510_v29 }
 0x21c   :  { %1610 = vst.msk [vmem:[%s2798_s4 + $0x18] sm:$0xff] %vm1526_vm1, %v1586_v28 }
 0x21e   :  { %v1591_v30 = vpop.xlane.xlu0 %1590 }
 0x21f   :  { %v1515_v31 = vpop.xlane.xlu1 %1514  ;;  %1611 = vst.msk [vmem:[%s2798_s4 + $0x20] sm:$0xff] %vm1526_vm1, %v1591_v30 }
 0x220   :  { %1532 = vst.msk [vmem:[%s2797_s3 + $0x28] sm:$0xff] %vm1526_vm1, %v1515_v31 }
 0x222   :  { %v1520_v33 = vpop.xlane.xlu0 %1519 }
 0x223   :  { %v1596_v32 = vpop.xlane.xlu1 %1595  ;;  %1533 = vst.msk [vmem:[%s2797_s3 + $0x30] sm:$0xff] %vm1526_vm1, %v1520_v33 }
 0x224   :  { %1612 = vst.msk [vmem:[%s2798_s4 + $0x28] sm:$0xff] %vm1526_vm1, %v1596_v32 }
 0x226   :  { %v1601_v35 = vpop.xlane.xlu0 %1600 }
 0x227   :  { %v1525_v34 = vpop.xlane.xlu1 %1524  ;;  %1613 = vst.msk [vmem:[%s2798_s4 + $0x30] sm:$0xff] %vm1526_vm1, %v1601_v35 }
 0x228   :  { %1534 = vst.msk [vmem:[%s2797_s3 + $0x38] sm:$0xff] %vm1526_vm1, %v1525_v34 }
 0x22b   :  { %v1606_v36 = vpop.xlane.xlu1 %1605 }
 0x22c   :  { %1614 = vst.msk [vmem:[%s2798_s4 + $0x38] sm:$0xff] %vm1526_vm1, %v1606_v36 }

// kernel: usrm4_forward.21
= control target key start
LH: loop header
LB: loop body
LE: loop exit
PB: predicated region body
PF: predicated region fallthrough
CT: control target
= control target key end

     0   :  { %v149_v0 = vmov 0   ;;  %s266_s0 = inlined_call_operand.vmem [shape: f32[64,1], index: 0, kind: input, shape index: {}]   ;;  %s267_s1 = inlined_call_operand.vmem [shape: f32[64,1], index: 1, kind: input, shape index: {}]   ;;  %s268_s2 = inlined_call_operand.vmem [shape: f32[64,128], index: 2, kind: input, shape index: {}]   ;;  %s269_s3 = inlined_call_operand.vmem [shape: f32[64,128], index: 3, kind: output, shape index: {}]  }
   0x1   :  { %148 = vset.pattern.permute.xlu1 %v149_v0  ;;  %147 = vset.pattern.permute.xlu0 %v149_v0  ;;  %v24_v1 = vld [vmem:[%s266_s0 + $0x10] sm:$0xff]  ;;  %v22_v2 = vld [vmem:[%s266_s0] sm:$0xff]  ;;  %v25_v3 = vld [vmem:[%s266_s0 + $0x18] sm:$0xff] }
   0x2   :  { %42 = vperm.xlu1 %148, %v24_v1   ;;  %32 = vperm.xlu0 %147, %v22_v2   ;;  %v23_v4 = vld [vmem:[%s266_s0 + $0x8] sm:$0xff]  ;;  %v26_v6 = vld [vmem:[%s266_s0 + $0x20] sm:$0xff]  ;;  %v29_v7 = vld [vmem:[%s266_s0 + $0x38] sm:$0xff] }
   0x3   :  { %v27_v5 = vld [vmem:[%s266_s0 + $0x28] sm:$0xff]  ;;  %v28_v8 = vld [vmem:[%s266_s0 + $0x30] sm:$0xff]  ;;  %v78_v10 = vld [vmem:[%s267_s1] sm:$0xff] }
   0x4   :  { %v79_v9 = vld [vmem:[%s267_s1 + $0x8] sm:$0xff]  ;;  %v81_v11 = vld [vmem:[%s267_s1 + $0x18] sm:$0xff]  ;;  %v80_v12 = vld [vmem:[%s267_s1 + $0x10] sm:$0xff] }
   0x5   :  { %v83_v13 = vld [vmem:[%s267_s1 + $0x28] sm:$0xff]  ;;  %v82_v14 = vld [vmem:[%s267_s1 + $0x20] sm:$0xff]  ;;  %v85_v15 = vld [vmem:[%s267_s1 + $0x38] sm:$0xff] }
   0x6   :  { %47 = vperm.xlu1 %148, %v25_v3   ;;  %37 = vperm.xlu0 %147, %v23_v4   ;;  %v84_v16 = vld [vmem:[%s267_s1 + $0x30] sm:$0xff]  ;;  %v14_v23 = vld [vmem:[%s268_s2] sm:$0xff]  ;;  %v15_v24 = vld [vmem:[%s268_s2 + $0x8] sm:$0xff] }
   0x7   :  { %v16_v29 = vld [vmem:[%s268_s2 + $0x10] sm:$0xff]  ;;  %v17_v30 = vld [vmem:[%s268_s2 + $0x18] sm:$0xff]  ;;  %v19_v37 = vld [vmem:[%s268_s2 + $0x28] sm:$0xff] }
   0x8   :  { %v18_v38 = vld [vmem:[%s268_s2 + $0x20] sm:$0xff]  ;;  %v21_v45 = vld [vmem:[%s268_s2 + $0x38] sm:$0xff]  ;;  %v20_v46 = vld [vmem:[%s268_s2 + $0x30] sm:$0xff] }
   0xa   :  { %57 = vperm.xlu1 %148, %v27_v5   ;;  %52 = vperm.xlu0 %147, %v26_v6  }
   0xe   :  { %67 = vperm.xlu1 %148, %v29_v7   ;;  %62 = vperm.xlu0 %147, %v28_v8  }
  0x12   :  { %93 = vperm.xlu1 %148, %v79_v9   ;;  %88 = vperm.xlu0 %147, %v78_v10  }
  0x16   :  { %103 = vperm.xlu1 %148, %v81_v11   ;;  %98 = vperm.xlu0 %147, %v80_v12  }
  0x1a   :  { %113 = vperm.xlu1 %148, %v83_v13   ;;  %108 = vperm.xlu0 %147, %v82_v14  }
  0x1e   :  { %123 = vperm.xlu1 %148, %v85_v15   ;;  %118 = vperm.xlu0 %147, %v84_v16  }
  0x81   :  { %v43_v17 = vpop.permute.xlu1 %42  ;;  %v33_v18 = vpop.permute.xlu0 %32 }
  0x82   :  { %v70_v27 = vmul.f32 %v33_v18, %v14_v23  ;;  %v72_v35 = vmul.f32 %v43_v17, %v16_v29 }
  0x85   :  { %v48_v19 = vpop.permute.xlu1 %47  ;;  %v38_v20 = vpop.permute.xlu0 %37 }
  0x86   :  { %v71_v28 = vmul.f32 %v38_v20, %v15_v24  ;;  %v73_v36 = vmul.f32 %v48_v19, %v17_v30 }
  0x89   :  { %v58_v21 = vpop.permute.xlu1 %57  ;;  %v53_v22 = vpop.permute.xlu0 %52 }
  0x8a   :  { %v75_v43 = vmul.f32 %v58_v21, %v19_v37  ;;  %v74_v44 = vmul.f32 %v53_v22, %v18_v38 }
  0x8d   :  { %v68_v25 = vpop.permute.xlu1 %67  ;;  %v63_v26 = vpop.permute.xlu0 %62 }
  0x8e   :  { %v77_v51 = vmul.f32 %v68_v25, %v21_v45  ;;  %v76_v52 = vmul.f32 %v63_v26, %v20_v46 }
  0x91   :  { %v94_v31 = vpop.permute.xlu1 %93  ;;  %v89_v32 = vpop.permute.xlu0 %88 }
  0x92   :  { %v127_v33 = vadd.f32 %v94_v31, %v71_v28  ;;  %v126_v34 = vadd.f32 %v89_v32, %v70_v27 }
  0x94   :  { %135 = vst [vmem:[%s269_s3 + $0x8] sm:$0xff] %v127_v33  ;;  %134 = vst [vmem:[%s269_s3] sm:$0xff] %v126_v34 }
  0x95   :  { %v104_v39 = vpop.permute.xlu1 %103  ;;  %v99_v40 = vpop.permute.xlu0 %98 }
  0x96   :  { %v129_v41 = vadd.f32 %v104_v39, %v73_v36  ;;  %v128_v42 = vadd.f32 %v99_v40, %v72_v35 }
  0x98   :  { %137 = vst [vmem:[%s269_s3 + $0x18] sm:$0xff] %v129_v41  ;;  %136 = vst [vmem:[%s269_s3 + $0x10] sm:$0xff] %v128_v42 }
  0x99   :  { %v114_v47 = vpop.permute.xlu1 %113  ;;  %v109_v48 = vpop.permute.xlu0 %108 }
  0x9a   :  { %v131_v49 = vadd.f32 %v114_v47, %v75_v43  ;;  %v130_v50 = vadd.f32 %v109_v48, %v74_v44 }
  0x9c   :  { %139 = vst [vmem:[%s269_s3 + $0x28] sm:$0xff] %v131_v49  ;;  %138 = vst [vmem:[%s269_s3 + $0x20] sm:$0xff] %v130_v50 }
  0x9d   :  { %v124_v53 = vpop.permute.xlu1 %123  ;;  %v119_v54 = vpop.permute.xlu0 %118 }
  0x9e   :  { %v133_v55 = vadd.f32 %v124_v53, %v77_v51  ;;  %v132_v56 = vadd.f32 %v119_v54, %v76_v52 }
  0xa0   :  { %141 = vst [vmem:[%s269_s3 + $0x38] sm:$0xff] %v133_v55  ;;  %140 = vst [vmem:[%s269_s3 + $0x30] sm:$0xff] %v132_v56 }

// kernel: usrm4_forward.20
= control target key start
LH: loop header
LB: loop body
LE: loop exit
PB: predicated region body
PF: predicated region fallthrough
CT: control target
= control target key end

     0   :  { %vm427_vm0 = vcmask 523264   ;;  %vm659_vm1 = vcmask 7168   ;;  %s1229_s1 = inlined_call_operand.vmem [shape: bf16[576,128], index: 1, kind: input, shape index: {}]   ;;  %s1230_s0 = inlined_call_operand.vmem [shape: bf16[64,576], index: 0, kind: input, shape index: {}]   ;;  %s1231_s2 = inlined_call_operand.vmem [shape: f32[64,128], index: 2, kind: output, shape index: {0}]   ;;  %s1232_s3 = inlined_call_operand.vmem [shape: f32[1,64,1], index: 3, kind: output, shape index: {1}]   ;;  %s1233_s4 = inlined_call_operand.vmem [shape: f32[1,64,1], index: 4, kind: output, shape index: {2}]  }
   0x1   :  { %v884_v0 = vld [vmem:[%s1229_s1 + $0x40] sm:$0xff]   ;;  %v888_v4 = vld [vmem:[%s1229_s1 + $0x48] sm:$0xff]   ;;  %v892_v8 = vld [vmem:[%s1229_s1 + $0x50] sm:$0xff]  }
   0x2   :  { %v885_v1 = vld [vmem:[%s1229_s1 + $0xc0] sm:$0xff]   ;;  %772 = vmatprep.subr.bf16.mxu0 %v884_v0  ;;  %v889_v5 = vld [vmem:[%s1229_s1 + $0xc8] sm:$0xff]   ;;  %v893_v9 = vld [vmem:[%s1229_s1 + $0xd0] sm:$0xff]  }
   0x3   :  { %v886_v2 = vld [vmem:[%s1229_s1] sm:$0xff]   ;;  %812 = vmatprep.subr.bf16.mxu1 %v885_v1  ;;  %v890_v6 = vld [vmem:[%s1229_s1 + $0x8] sm:$0xff]   ;;  %v894_v10 = vld [vmem:[%s1229_s1 + $0x10] sm:$0xff]  }
   0x4   :  { %v887_v3 = vld [vmem:[%s1229_s1 + $0x80] sm:$0xff]   ;;  %773 = vmatpush3.bf16.msra.mxu0 %v886_v2  ;;  %v891_v7 = vld [vmem:[%s1229_s1 + $0x88] sm:$0xff]   ;;  %v895_v11 = vld [vmem:[%s1229_s1 + $0x90] sm:$0xff]  }
   0x5   :  { %813 = vmatpush3.bf16.msra.mxu1 %v887_v3  ;;  %774 = vmatprep.subr.bf16.mxu0 %v888_v4  ;;  %v896_v12 = vld [vmem:[%s1229_s1 + $0x58] sm:$0xff]   ;;  %v900_v16 = vld [vmem:[%s1229_s1 + $0x60] sm:$0xff]   ;;  %v904_v20 = vld [vmem:[%s1229_s1 + $0x68] sm:$0xff]  }
   0x6   :  { %814 = vmatprep.subr.bf16.mxu1 %v889_v5  ;;  %v897_v13 = vld [vmem:[%s1229_s1 + $0xd8] sm:$0xff]   ;;  %v901_v17 = vld [vmem:[%s1229_s1 + $0xe0] sm:$0xff]   ;;  %v905_v21 = vld [vmem:[%s1229_s1 + $0xe8] sm:$0xff]  }
   0x7   :  { %v898_v14 = vld [vmem:[%s1229_s1 + $0x18] sm:$0xff]   ;;  %v902_v18 = vld [vmem:[%s1229_s1 + $0x20] sm:$0xff]   ;;  %v906_v22 = vld [vmem:[%s1229_s1 + $0x28] sm:$0xff]  }
   0x8   :  { %775 = vmatpush3.bf16.msra.mxu0 %v890_v6  ;;  %v899_v15 = vld [vmem:[%s1229_s1 + $0x98] sm:$0xff]   ;;  %v903_v19 = vld [vmem:[%s1229_s1 + $0xa0] sm:$0xff]   ;;  %v907_v23 = vld [vmem:[%s1229_s1 + $0xa8] sm:$0xff]  }
   0x9   :  { %815 = vmatpush3.bf16.msra.mxu1 %v891_v7  ;;  %776 = vmatprep.subr.bf16.mxu0 %v892_v8  ;;  %v908_v24 = vld [vmem:[%s1229_s1 + $0x70] sm:$0xff]   ;;  %v912_v28 = vld [vmem:[%s1229_s1 + $0x78] sm:$0xff]   ;;  %v921_v35 = vld [vmem:[%s1230_s0 + $0xc] ss:$20 sps:$4 sm:$0xff]  }
   0xa   :  { %816 = vmatprep.subr.bf16.mxu1 %v893_v9  ;;  %v909_v25 = vld [vmem:[%s1229_s1 + $0xf0] sm:$0xff]   ;;  %v913_v29 = vld [vmem:[%s1229_s1 + $0xf8] sm:$0xff]   ;;  %v922_v36 = vld [vmem:[%s1229_s1 + $0x100] sm:$0xff]   ;;  %537 = vmatprep.mubr.bf16.mxu1 %v921_v35 }
   0xb   :  { %v910_v26 = vld [vmem:[%s1229_s1 + $0x30] sm:$0xff]   ;;  %v914_v30 = vld [vmem:[%s1229_s1 + $0x38] sm:$0xff]   ;;  %v923_v37 = vld [vmem:[%s1230_s0 + $0x2c] ss:$20 sps:$4 sm:$0xff]  }
   0xc   :  { %777 = vmatpush3.bf16.msra.mxu0 %v894_v10  ;;  %v911_v27 = vld [vmem:[%s1229_s1 + $0xb0] sm:$0xff]   ;;  %v915_v31 = vld [vmem:[%s1229_s1 + $0xb8] sm:$0xff]   ;;  %v929_v39 = vld [vmem:[%s1229_s1 + $0x108] sm:$0xff]  }
   0xd   :  { %817 = vmatpush3.bf16.msra.mxu1 %v895_v11  ;;  %778 = vmatprep.subr.bf16.mxu0 %v896_v12  ;;  %v916_v32 = vld [vmem:[%s1230_s0] ss:$20 sps:$4 sm:$0xff]   ;;  %v918_v33 = vld [vmem:[%s1230_s0 + $0x4] ss:$20 sps:$4 sm:$0xff]   ;;  %v919_v34 = vld [vmem:[%s1230_s0 + $0x8] ss:$20 sps:$4 sm:$0xff]  }
   0xe   :  { %818 = vmatprep.subr.bf16.mxu1 %v897_v13  ;;  %472 = vmatprep.mubr.bf16.mxu0 %v918_v33  ;;  %v925_v38 = vld [vmem:[%s1230_s0 + $0x34] ss:$20 sps:$4 sm:$0xff]   ;;  %v928_v41 = vld [vmem:[%s1230_s0 + $0x30] ss:$20 sps:$4 sm:$0xff]   ;;  %v943_v45 = vld [vmem:[%s1229_s1 + $0x118] sm:$0xff]  }
   0xf   :  { %v927_v40 = vld [vmem:[%s1230_s0 + $0x28] ss:$20 sps:$4 sm:$0xff]   ;;  %v936_v44 = vld [vmem:[%s1229_s1 + $0x110] sm:$0xff]   ;;  %v935_v47 = vld [vmem:[%s1230_s0 + $0x58] ss:$20 sps:$4 sm:$0xff]  }
  0x10   :  { %779 = vmatpush3.bf16.msra.mxu0 %v898_v14  ;;  %v930_v42 = vld [vmem:[%s1230_s0 + $0x54] ss:$20 sps:$4 sm:$0xff]   ;;  %v932_v43 = vld [vmem:[%s1230_s0 + $0x5c] ss:$20 sps:$4 sm:$0xff]   ;;  %v939_v49 = vld [vmem:[%s1230_s0 + $0x84] ss:$20 sps:$4 sm:$0xff]  }
  0x11   :  { %819 = vmatpush3.bf16.msra.mxu1 %v899_v15  ;;  %780 = vmatprep.subr.bf16.mxu0 %v900_v16  ;;  %v934_v46 = vld [vmem:[%s1230_s0 + $0x50] ss:$20 sps:$4 sm:$0xff]   ;;  %v941_v50 = vld [vmem:[%s1230_s0 + $0x78] ss:$20 sps:$4 sm:$0xff]   ;;  %v942_v51 = vld [vmem:[%s1230_s0 + $0x80] ss:$20 sps:$4 sm:$0xff]  }
  0x12   :  { %820 = vmatprep.subr.bf16.mxu1 %v901_v17  ;;  %v937_v48 = vld [vmem:[%s1230_s0 + $0x7c] ss:$20 sps:$4 sm:$0xff]   ;;  %v945_v53 = vld [vmem:[%s1230_s0 + $0x60] ss:$20 sps:$4 sm:$0xff]   ;;  %v946_v54 = vld [vmem:[%s1230_s0 + $0x38] ss:$20 sps:$4 sm:$0xff]  }
  0x13   :  { %v944_v52 = vld [vmem:[%s1230_s0 + $0x10] ss:$20 sps:$4 sm:$0xff]   ;;  %v947_v55 = vld [vmem:[%s1230_s0 + $0x88] ss:$20 sps:$4 sm:$0xff]  }
  0x14   :  { %781 = vmatpush3.bf16.msra.mxu0 %v902_v18 }
  0x15   :  { %821 = vmatpush3.bf16.msra.mxu1 %v903_v19  ;;  %782 = vmatprep.subr.bf16.mxu0 %v904_v20 }
  0x16   :  { %822 = vmatprep.subr.bf16.mxu1 %v905_v21 }
  0x18   :  { %783 = vmatpush3.bf16.msra.mxu0 %v906_v22 }
  0x19   :  { %823 = vmatpush3.bf16.msra.mxu1 %v907_v23  ;;  %784 = vmatprep.subr.bf16.mxu0 %v908_v24 }
  0x1a   :  { %824 = vmatprep.subr.bf16.mxu1 %v909_v25 }
  0x1c   :  { %785 = vmatpush3.bf16.msra.mxu0 %v910_v26 }
  0x1d   :  { %825 = vmatpush3.bf16.msra.mxu1 %v911_v27  ;;  %786 = vmatprep.subr.bf16.mxu0 %v912_v28 }
  0x1e   :  { %826 = vmatprep.subr.bf16.mxu1 %v913_v29 }
  0x20   :  { %787 = vmatpush3.bf16.msra.mxu0 %v914_v30 }
  0x21   :  { %827 = vmatpush3.bf16.msra.mxu1 %v915_v31  ;;  %860 = vmatprep.subr.bf16.mxu0 %v922_v36 }
  0x22   :  { %876 = vmatprep.subr.bf16.mxu1 %v922_v36 }
  0x23   :  { %473 = vmatmul.mubr.bf16.vlgmr.msra.gmra.mrb[0].mxu0 %v916_v32 }
  0x24   :  { %538 = vmatmul.mubr.bf16.vlgmr.msra.gmra.mrb[0].mxu1 %v919_v34  ;;  %861 = vmatpush3.bf16.msra.mxu0 %v922_v36 }
  0x25   :  { %880 = vmatpush3.bf16.msra.mxu1 %v922_v36  ;;  %480 = vmatprep.mubr.bf16.mxu0 %v923_v37 }
  0x26   :  { %545 = vmatprep.mubr.bf16.mxu1 %v925_v38  ;;  %862 = vmatprep.subr.bf16.mxu0 %v929_v39 }
  0x27   :  { %877 = vmatprep.subr.bf16.mxu1 %v929_v39 }
  0x28   :  { %863 = vmatpush3.bf16.msra.mxu0 %v929_v39 }
  0x29   :  { %881 = vmatpush3.bf16.msra.mxu1 %v929_v39  ;;  %864 = vmatprep.subr.bf16.mxu0 %v936_v44 }
  0x2a   :  { %878 = vmatprep.subr.bf16.mxu1 %v936_v44 }
  0x2b   :  { %481 = vmatmul.mubr.bf16.gmra.mrb[4].mxu0 %v927_v40 }
  0x2c   :  { %546 = vmatmul.mubr.bf16.gmra.mrb[4].mxu1 %v928_v41  ;;  %488 = vmatprep.mubr.bf16.mxu0 %v930_v42 }
  0x2d   :  { %553 = vmatprep.mubr.bf16.mxu1 %v932_v43  ;;  %865 = vmatpush3.bf16.msra.mxu0 %v936_v44 }
  0x2e   :  { %882 = vmatpush3.bf16.msra.mxu1 %v936_v44  ;;  %866 = vmatprep.subr.bf16.mxu0 %v943_v45 }
  0x2f   :  { %879 = vmatprep.subr.bf16.mxu1 %v943_v45 }
  0x31   :  { %867 = vmatpush3.bf16.msra.mxu0 %v943_v45 }
  0x32   :  { %883 = vmatpush3.bf16.msra.mxu1 %v943_v45 }
  0x33   :  { %489 = vmatmul.mubr.bf16.gmra.mrb[8].mxu0 %v934_v46 }
  0x34   :  { %554 = vmatmul.mubr.bf16.gmra.mrb[8].mxu1 %v935_v47  ;;  %496 = vmatprep.mubr.bf16.mxu0 %v937_v48 }
  0x35   :  { %561 = vmatprep.mubr.bf16.mxu1 %v939_v49 }
  0x3b   :  { %497 = vmatmul.mubr.bf16.gmra.mrb[12].mxu0 %v941_v50 }
  0x3c   :  { %562 = vmatmul.mubr.bf16.gmra.mrb[12].mxu1 %v942_v51  ;;  %868 = vmatprep.mubr.msk.bf16.mxu0 %vm427_vm0, %v944_v52 }
  0x3d   :  { %872 = vmatprep.mubr.msk.bf16.mxu1 %vm427_vm0, %v945_v53 }
  0x43   :  { %869 = vmatmul.mubr.msk.bf16.vlgmr.msra.gmra.mrb[16].mxu0 %vm427_vm0, %v946_v54 }
  0x44   :  { %873 = vmatmul.mubr.msk.bf16.vlgmr.msra.gmra.mrb[16].mxu1 %vm427_vm0, %v947_v55 }
  0xf6   :  { %v788_v56 = vpop.f32.mrb[0].mxu0 }
  0xf7   :  { %v828_v57 = vpop.f32.mrb[0].mxu1  ;;  %v789_v58 = vpop.f32.mrb[1].mxu0 }
  0xf8   :  { %v790_v59 = vadd.f32 %v789_v58, %v788_v56  ;;  %v829_v60 = vpop.f32.mrb[1].mxu1  ;;  %v791_v61 = vpop.f32.mrb[2].mxu0 }
  0xf9   :  { %v830_v62 = vadd.f32 %v829_v60, %v828_v57  ;;  %v831_v63 = vpop.f32.mrb[2].mxu1  ;;  %v792_v0 = vpop.f32.mrb[3].mxu0 }
  0xfa   :  { %v793_v1 = vadd.f32 %v792_v0, %v791_v61  ;;  %v832_v2 = vpop.f32.mrb[3].mxu1 }
  0xfb   :  { %v833_v3 = vadd.f32 %v832_v2, %v831_v63  ;;  %v540_v4 = vadd.f32 %v830_v62, %v790_v59 }
  0xfd   :  { %v543_v5 = vadd.f32 %v833_v3, %v793_v1 }
  0xfe   :  { %v794_v6 = vpop.f32.mrb[4].mxu0 }
  0xff   :  { %v834_v7 = vpop.f32.mrb[4].mxu1  ;;  %v795_v8 = vpop.f32.mrb[5].mxu0 }
 0x100   :  { %v796_v9 = vadd.f32 %v795_v8, %v794_v6  ;;  %v835_v10 = vpop.f32.mrb[5].mxu1  ;;  %v797_v11 = vpop.f32.mrb[6].mxu0 }
 0x101   :  { %v836_v12 = vadd.f32 %v835_v10, %v834_v7  ;;  %v837_v13 = vpop.f32.mrb[6].mxu1  ;;  %v798_v14 = vpop.f32.mrb[7].mxu0 }
 0x102   :  { %v799_v15 = vadd.f32 %v798_v14, %v797_v11  ;;  %v838_v16 = vpop.f32.mrb[7].mxu1 }
 0x103   :  { %v839_v17 = vadd.f32 %v838_v16, %v837_v13  ;;  %v548_v18 = vadd.f32 %v836_v12, %v796_v9 }
 0x105   :  { %v551_v19 = vadd.f32 %v839_v17, %v799_v15 }
 0x106   :  { %v800_v20 = vpop.f32.mrb[8].mxu0 }
 0x107   :  { %v840_v21 = vpop.f32.mrb[8].mxu1  ;;  %v801_v22 = vpop.f32.mrb[9].mxu0 }
 0x108   :  { %v802_v23 = vadd.f32 %v801_v22, %v800_v20  ;;  %v841_v24 = vpop.f32.mrb[9].mxu1  ;;  %v803_v25 = vpop.f32.mrb[10].mxu0 }
 0x109   :  { %v842_v26 = vadd.f32 %v841_v24, %v840_v21  ;;  %v843_v27 = vpop.f32.mrb[10].mxu1  ;;  %v804_v28 = vpop.f32.mrb[11].mxu0 }
 0x10a   :  { %v805_v29 = vadd.f32 %v804_v28, %v803_v25  ;;  %v844_v30 = vpop.f32.mrb[11].mxu1 }
 0x10b   :  { %v845_v31 = vadd.f32 %v844_v30, %v843_v27  ;;  %v556_v32 = vadd.f32 %v842_v26, %v802_v23 }
 0x10d   :  { %v559_v33 = vadd.f32 %v845_v31, %v805_v29 }
 0x10e   :  { %v806_v34 = vpop.f32.mrb[12].mxu0 }
 0x10f   :  { %v846_v35 = vpop.f32.mrb[12].mxu1  ;;  %v807_v36 = vpop.f32.mrb[13].mxu0 }
 0x110   :  { %v808_v37 = vadd.f32 %v807_v36, %v806_v34  ;;  %v847_v38 = vpop.f32.mrb[13].mxu1  ;;  %v809_v39 = vpop.f32.mrb[14].mxu0 }
 0x111   :  { %v848_v40 = vadd.f32 %v847_v38, %v846_v35  ;;  %v849_v41 = vpop.f32.mrb[14].mxu1  ;;  %v810_v42 = vpop.f32.mrb[15].mxu0 }
 0x112   :  { %v811_v43 = vadd.f32 %v810_v42, %v809_v39  ;;  %v850_v44 = vpop.f32.mrb[15].mxu1 }
 0x113   :  { %v851_v45 = vadd.f32 %v850_v44, %v849_v41  ;;  %v564_v46 = vadd.f32 %v848_v40, %v808_v37 }
 0x115   :  { %v567_v47 = vadd.f32 %v851_v45, %v811_v43 }
 0x116   :  { %v870_v48 = vpop.f32.mrb[16].mxu0 }
 0x117   :  { %v613_v49 = vadd.f32 %v870_v48, %v548_v18  ;;  %v874_v50 = vpop.f32.mrb[16].mxu1  ;;  %v604_v51 = vpop.f32.mrb[17].mxu0 }
 0x118   :  { %v629_v52 = vadd.f32 %v874_v50, %v564_v46  ;;  %v605_v53 = vadd.f32 %v604_v51, %v540_v4  ;;  %v620_v54 = vpop.f32.mrb[17].mxu1  ;;  %v871_v55 = vpop.f32.mrb[18].mxu0 }
 0x119   :  { %637 = vst [vmem:[%s1231_s2 + $0x10] sm:$0xff] %v613_v49  ;;  %v621_v56 = vadd.f32 %v620_v54, %v556_v32  ;;  %v616_v57 = vadd.f32 %v871_v55, %v551_v19  ;;  %v875_v58 = vpop.f32.mrb[18].mxu1  ;;  %v607_v59 = vpop.f32.mrb[19].mxu0  ;;  %647 = vadd.xlane.f32.xlu1 %v613_v49  ;;  %v670_v0 = vmul.f32 %v613_v49, %v613_v49 }
 0x11a   :  { %641 = vst [vmem:[%s1231_s2 + $0x30] sm:$0xff] %v629_v52  ;;  %635 = vst [vmem:[%s1231_s2] sm:$0xff] %v605_v53  ;;  %v632_v60 = vadd.f32 %v875_v58, %v567_v47  ;;  %v608_v61 = vadd.f32 %v607_v59, %v543_v5  ;;  %v623_v62 = vpop.f32.mrb[19].mxu1  ;;  %655 = vadd.xlane.f32.xlu0 %v629_v52  ;;  %v668_v3 = vmul.f32 %v605_v53, %v605_v53 }
 0x11b   :  { %639 = vst [vmem:[%s1231_s2 + $0x20] sm:$0xff] %v621_v56  ;;  %638 = vst [vmem:[%s1231_s2 + $0x18] sm:$0xff] %v616_v57  ;;  %v624_v63 = vadd.f32 %v623_v62, %v559_v33  ;;  %v671_v1 = vmul.f32 %v616_v57, %v616_v57  ;;  %v672_v5 = vmul.f32 %v621_v56, %v621_v56 }
 0x11c   :  { %642 = vst [vmem:[%s1231_s2 + $0x38] sm:$0xff] %v632_v60  ;;  %636 = vst [vmem:[%s1231_s2 + $0x8] sm:$0xff] %v608_v61  ;;  %v669_v2 = vmul.f32 %v608_v61, %v608_v61  ;;  %v675_v6 = vmul.f32 %v632_v60, %v632_v60  ;;  %v674_v7 = vmul.f32 %v629_v52, %v629_v52 }
 0x11d   :  { %640 = vst [vmem:[%s1231_s2 + $0x28] sm:$0xff] %v624_v63  ;;  %649 = vadd.xlane.f32.xlu1 %v616_v57  ;;  %v673_v4 = vmul.f32 %v624_v63, %v624_v63 }
 0x11e   :  { %643 = vadd.xlane.f32.xlu0 %v605_v53 }
 0x121   :  { %657 = vadd.xlane.f32.xlu1 %v632_v60 }
 0x122   :  { %651 = vadd.xlane.f32.xlu0 %v621_v56 }
 0x125   :  { %653 = vadd.xlane.f32.xlu1 %v624_v63 }
 0x126   :  { %680 = vadd.xlane.f32.xlu0 %v670_v0 }
 0x129   :  { %682 = vadd.xlane.f32.xlu1 %v671_v1 }
 0x12a   :  { %645 = vadd.xlane.f32.xlu0 %v608_v61 }
 0x12d   :  { %678 = vadd.xlane.f32.xlu1 %v669_v2 }
 0x12e   :  { %676 = vadd.xlane.f32.xlu0 %v668_v3 }
 0x131   :  { %686 = vadd.xlane.f32.xlu1 %v673_v4 }
 0x132   :  { %684 = vadd.xlane.f32.xlu0 %v672_v5 }
 0x135   :  { %690 = vadd.xlane.f32.xlu1 %v675_v6 }
 0x136   :  { %688 = vadd.xlane.f32.xlu0 %v674_v7 }
 0x1a6   :  { %v648_v8 = vpop.xlane.xlu1 %647 }
 0x1a7   :  { %v656_v9 = vpop.xlane.xlu0 %655  ;;  %662 = vst.msk [vmem:[%s1232_s3 + $0x10] sm:$0xff] %vm659_vm1, %v648_v8 }
 0x1a8   :  { %666 = vst.msk [vmem:[%s1232_s3 + $0x30] sm:$0xff] %vm659_vm1, %v656_v9 }
 0x1aa   :  { %v650_v10 = vpop.xlane.xlu1 %649 }
 0x1ab   :  { %663 = vst.msk [vmem:[%s1232_s3 + $0x18] sm:$0xff] %vm659_vm1, %v650_v10  ;;  %v644_v11 = vpop.xlane.xlu0 %643 }
 0x1ac   :  { %660 = vst.msk [vmem:[%s1232_s3] sm:$0xff] %vm659_vm1, %v644_v11 }
 0x1ae   :  { %v658_v12 = vpop.xlane.xlu1 %657 }
 0x1af   :  { %667 = vst.msk [vmem:[%s1232_s3 + $0x38] sm:$0xff] %vm659_vm1, %v658_v12  ;;  %v652_v13 = vpop.xlane.xlu0 %651 }
 0x1b0   :  { %664 = vst.msk [vmem:[%s1232_s3 + $0x20] sm:$0xff] %vm659_vm1, %v652_v13 }
 0x1b2   :  { %v654_v14 = vpop.xlane.xlu1 %653 }
 0x1b3   :  { %665 = vst.msk [vmem:[%s1232_s3 + $0x28] sm:$0xff] %vm659_vm1, %v654_v14  ;;  %v681_v15 = vpop.xlane.xlu0 %680 }
 0x1b4   :  { %694 = vst.msk [vmem:[%s1233_s4 + $0x10] sm:$0xff] %vm659_vm1, %v681_v15 }
 0x1b6   :  { %v683_v16 = vpop.xlane.xlu1 %682 }
 0x1b7   :  { %695 = vst.msk [vmem:[%s1233_s4 + $0x18] sm:$0xff] %vm659_vm1, %v683_v16  ;;  %v646_v17 = vpop.xlane.xlu0 %645 }
 0x1b8   :  { %661 = vst.msk [vmem:[%s1232_s3 + $0x8] sm:$0xff] %vm659_vm1, %v646_v17 }
 0x1ba   :  { %v679_v18 = vpop.xlane.xlu1 %678 }
 0x1bb   :  { %693 = vst.msk [vmem:[%s1233_s4 + $0x8] sm:$0xff] %vm659_vm1, %v679_v18  ;;  %v677_v19 = vpop.xlane.xlu0 %676 }
 0x1bc   :  { %692 = vst.msk [vmem:[%s1233_s4] sm:$0xff] %vm659_vm1, %v677_v19 }
 0x1be   :  { %v687_v20 = vpop.xlane.xlu1 %686 }
 0x1bf   :  { %697 = vst.msk [vmem:[%s1233_s4 + $0x28] sm:$0xff] %vm659_vm1, %v687_v20  ;;  %v685_v21 = vpop.xlane.xlu0 %684 }
 0x1c0   :  { %696 = vst.msk [vmem:[%s1233_s4 + $0x20] sm:$0xff] %vm659_vm1, %v685_v21 }
 0x1c2   :  { %v691_v22 = vpop.xlane.xlu1 %690 }
 0x1c3   :  { %699 = vst.msk [vmem:[%s1233_s4 + $0x38] sm:$0xff] %vm659_vm1, %v691_v22  ;;  %v689_v23 = vpop.xlane.xlu0 %688 }
 0x1c4   :  { %698 = vst.msk [vmem:[%s1233_s4 + $0x30] sm:$0xff] %vm659_vm1, %v689_v23 }

// kernel: usrm4_forward.31
= control target key start
LH: loop header
LB: loop body
LE: loop exit
PB: predicated region body
PF: predicated region fallthrough
CT: control target
= control target key end

     0   :  { %v245_v0 = vmov 0   ;;  %s530_s0 = inlined_call_operand.vmem [shape: f32[64,1], index: 0, kind: input, shape index: {}]   ;;  %s531_s1 = inlined_call_operand.vmem [shape: f32[64,1], index: 1, kind: input, shape index: {}]   ;;  %s532_s2 = inlined_call_operand.vmem [shape: f32[64,512], index: 2, kind: input, shape index: {}]   ;;  %s533_s3 = inlined_call_operand.vmem [shape: f32[64,512], index: 3, kind: output, shape index: {}]  }
   0x1   :  { %244 = vset.pattern.permute.xlu1 %v245_v0  ;;  %243 = vset.pattern.permute.xlu0 %v245_v0  ;;  %v48_v1 = vld [vmem:[%s530_s0 + $0x10] sm:$0xff]  ;;  %v46_v2 = vld [vmem:[%s530_s0] sm:$0xff]  ;;  %v49_v3 = vld [vmem:[%s530_s0 + $0x18] sm:$0xff] }
   0x2   :  { %66 = vperm.xlu1 %244, %v48_v1   ;;  %56 = vperm.xlu0 %243, %v46_v2   ;;  %v47_v4 = vld [vmem:[%s530_s0 + $0x8] sm:$0xff]  ;;  %v50_v6 = vld [vmem:[%s530_s0 + $0x20] sm:$0xff]  ;;  %v53_v7 = vld [vmem:[%s530_s0 + $0x38] sm:$0xff] }
   0x3   :  { %v51_v5 = vld [vmem:[%s530_s0 + $0x28] sm:$0xff]  ;;  %v52_v8 = vld [vmem:[%s530_s0 + $0x30] sm:$0xff]  ;;  %v126_v10 = vld [vmem:[%s531_s1] sm:$0xff] }
   0x4   :  { %v127_v9 = vld [vmem:[%s531_s1 + $0x8] sm:$0xff]  ;;  %v129_v11 = vld [vmem:[%s531_s1 + $0x18] sm:$0xff]  ;;  %v128_v12 = vld [vmem:[%s531_s1 + $0x10] sm:$0xff] }
   0x5   :  { %v131_v13 = vld [vmem:[%s531_s1 + $0x28] sm:$0xff]  ;;  %v130_v14 = vld [vmem:[%s531_s1 + $0x20] sm:$0xff]  ;;  %v133_v15 = vld [vmem:[%s531_s1 + $0x38] sm:$0xff] }
   0x6   :  { %71 = vperm.xlu1 %244, %v49_v3   ;;  %61 = vperm.xlu0 %243, %v47_v4   ;;  %v132_v16 = vld [vmem:[%s531_s1 + $0x30] sm:$0xff]  ;;  %v14_v23 = vld [vmem:[%s532_s2] sm:$0xff]  ;;  %v19_v25 = vld [vmem:[%s532_s2 + $0x28] sm:$0xff] }
   0x7   :  { %v18_v24 = vld [vmem:[%s532_s2 + $0x20] sm:$0xff]  ;;  %v20_v26 = vld [vmem:[%s532_s2 + $0x30] sm:$0xff]  ;;  %v21_v27 = vld [vmem:[%s532_s2 + $0x38] sm:$0xff] }
   0x8   :  { %v15_v30 = vld [vmem:[%s532_s2 + $0x8] sm:$0xff]  ;;  %v16_v31 = vld [vmem:[%s532_s2 + $0x10] sm:$0xff]  ;;  %v17_v32 = vld [vmem:[%s532_s2 + $0x18] sm:$0xff] }
   0x9   :  { %v22_v33 = vld [vmem:[%s532_s2 + $0x40] sm:$0xff]  ;;  %v27_v43 = vld [vmem:[%s532_s2 + $0x68] sm:$0xff]  ;;  %v28_v44 = vld [vmem:[%s532_s2 + $0x70] sm:$0xff] }
   0xa   :  { %81 = vperm.xlu1 %244, %v51_v5   ;;  %76 = vperm.xlu0 %243, %v50_v6   ;;  %v26_v34 = vld [vmem:[%s532_s2 + $0x60] sm:$0xff]  ;;  %v29_v45 = vld [vmem:[%s532_s2 + $0x78] sm:$0xff]  ;;  %v23_v48 = vld [vmem:[%s532_s2 + $0x48] sm:$0xff] }
   0xb   :  { %v24_v49 = vld [vmem:[%s532_s2 + $0x50] sm:$0xff]  ;;  %v25_v50 = vld [vmem:[%s532_s2 + $0x58] sm:$0xff]  ;;  %v34_v63 = vld [vmem:[%s532_s2 + $0xa0] sm:$0xff] }
   0xc   :  { %v35_v0 = vld [vmem:[%s532_s2 + $0xa8] sm:$0xff]  ;;  %v36_v5 = vld [vmem:[%s532_s2 + $0xb0] sm:$0xff]  ;;  %v37_v6 = vld [vmem:[%s532_s2 + $0xb8] sm:$0xff] }
   0xe   :  { %91 = vperm.xlu1 %244, %v53_v7   ;;  %86 = vperm.xlu0 %243, %v52_v8   ;;  %v30_v7 = vld [vmem:[%s532_s2 + $0x80] sm:$0xff] }
  0x12   :  { %141 = vperm.xlu1 %244, %v127_v9   ;;  %136 = vperm.xlu0 %243, %v126_v10   ;;  %v31_v10 = vld [vmem:[%s532_s2 + $0x88] sm:$0xff] }
  0x16   :  { %151 = vperm.xlu1 %244, %v129_v11   ;;  %146 = vperm.xlu0 %243, %v128_v12   ;;  %v32_v11 = vld [vmem:[%s532_s2 + $0x90] sm:$0xff]  ;;  %v33_v12 = vld [vmem:[%s532_s2 + $0x98] sm:$0xff] }
  0x1a   :  { %161 = vperm.xlu1 %244, %v131_v13   ;;  %156 = vperm.xlu0 %243, %v130_v14  }
  0x1e   :  { %171 = vperm.xlu1 %244, %v133_v15   ;;  %166 = vperm.xlu0 %243, %v132_v16  }
  0x81   :  { %v67_v17 = vpop.permute.xlu1 %66  ;;  %v57_v18 = vpop.permute.xlu0 %56 }
  0x82   :  { %v94_v39 = vmul.f32 %v57_v18, %v14_v23  ;;  %v95_v40 = vmul.f32 %v57_v18, %v15_v30  ;;  %v96_v41 = vmul.f32 %v57_v18, %v16_v31  ;;  %v97_v42 = vmul.f32 %v57_v18, %v17_v32 }
  0x83   :  { %v102_v1 = vmul.f32 %v67_v17, %v22_v33  ;;  %v103_v2 = vmul.f32 %v67_v17, %v23_v48  ;;  %v104_v3 = vmul.f32 %v67_v17, %v24_v49  ;;  %v105_v4 = vmul.f32 %v67_v17, %v25_v50 }
  0x85   :  { %v72_v19 = vpop.permute.xlu1 %71  ;;  %v62_v20 = vpop.permute.xlu0 %61 }
  0x86   :  { %v98_v35 = vmul.f32 %v62_v20, %v18_v24  ;;  %v99_v36 = vmul.f32 %v62_v20, %v19_v25  ;;  %v100_v37 = vmul.f32 %v62_v20, %v20_v26  ;;  %v101_v38 = vmul.f32 %v62_v20, %v21_v27  ;;  %v43_v27 = vld [vmem:[%s532_s2 + $0xe8] sm:$0xff] }
  0x87   :  { %v106_v59 = vmul.f32 %v72_v19, %v26_v34  ;;  %v107_v60 = vmul.f32 %v72_v19, %v27_v43  ;;  %v108_v61 = vmul.f32 %v72_v19, %v28_v44  ;;  %v109_v62 = vmul.f32 %v72_v19, %v29_v45  ;;  %v40_v43 = vld [vmem:[%s532_s2 + $0xd0] sm:$0xff]  ;;  %v41_v44 = vld [vmem:[%s532_s2 + $0xd8] sm:$0xff] }
  0x89   :  { %v314_v21 = vpop.permute.xlu1 %81  ;;  %v316_v22 = vpop.permute.xlu0 %76 }
  0x8a   :  { %v114_v23 = vmul.f32 %v314_v21, %v34_v63  ;;  %v115_v24 = vmul.f32 %v314_v21, %v35_v0  ;;  %v116_v25 = vmul.f32 %v314_v21, %v36_v5  ;;  %v117_v26 = vmul.f32 %v314_v21, %v37_v6  ;;  %v42_v21 = vld [vmem:[%s532_s2 + $0xe0] sm:$0xff] }
  0x8b   :  { %v110_v30 = vmul.f32 %v316_v22, %v30_v7  ;;  %v111_v31 = vmul.f32 %v316_v22, %v31_v10  ;;  %v112_v32 = vmul.f32 %v316_v22, %v32_v11  ;;  %v113_v33 = vmul.f32 %v316_v22, %v33_v12  ;;  %v44_v22 = vld [vmem:[%s532_s2 + $0xf0] sm:$0xff] }
  0x8d   :  { %v333_v28 = vpop.permute.xlu1 %91  ;;  %v335_v29 = vpop.permute.xlu0 %86 }
  0x8e   :  { %v122_v49 = vmul.f32 %v333_v28, %v42_v21  ;;  %v123_v50 = vmul.f32 %v333_v28, %v43_v27 }
  0x91   :  { %v142_v46 = vpop.permute.xlu1 %141  ;;  %v137_v47 = vpop.permute.xlu0 %136 }
  0x92   :  { %v178_v51 = vadd.f32 %v142_v46, %v98_v35  ;;  %v179_v52 = vadd.f32 %v142_v46, %v99_v36  ;;  %v180_v53 = vadd.f32 %v142_v46, %v100_v37  ;;  %v181_v54 = vadd.f32 %v142_v46, %v101_v38  ;;  %v45_v36 = vld [vmem:[%s532_s2 + $0xf8] sm:$0xff]  ;;  %v38_v37 = vld [vmem:[%s532_s2 + $0xc0] sm:$0xff] }
  0x93   :  { %v174_v55 = vadd.f32 %v137_v47, %v94_v39  ;;  %v175_v56 = vadd.f32 %v137_v47, %v95_v40  ;;  %v176_v57 = vadd.f32 %v137_v47, %v96_v41  ;;  %v177_v58 = vadd.f32 %v137_v47, %v97_v42  ;;  %v39_v42 = vld [vmem:[%s532_s2 + $0xc8] sm:$0xff] }
  0x94   :  { %210 = vst [vmem:[%s533_s3 + $0x20] sm:$0xff] %v178_v51  ;;  %211 = vst [vmem:[%s533_s3 + $0x28] sm:$0xff] %v179_v52  ;;  %v124_v51 = vmul.f32 %v333_v28, %v44_v22  ;;  %v125_v52 = vmul.f32 %v333_v28, %v45_v36  ;;  %v119_v28 = vmul.f32 %v335_v29, %v39_v42 }
  0x95   :  { %212 = vst [vmem:[%s533_s3 + $0x30] sm:$0xff] %v180_v53  ;;  %213 = vst [vmem:[%s533_s3 + $0x38] sm:$0xff] %v181_v54  ;;  %v152_v8 = vpop.permute.xlu1 %151  ;;  %v147_v9 = vpop.permute.xlu0 %146  ;;  %v118_v54 = vmul.f32 %v335_v29, %v38_v37 }
  0x96   :  { %206 = vst [vmem:[%s533_s3] sm:$0xff] %v174_v55  ;;  %207 = vst [vmem:[%s533_s3 + $0x8] sm:$0xff] %v175_v56  ;;  %v186_v13 = vadd.f32 %v152_v8, %v106_v59  ;;  %v187_v14 = vadd.f32 %v152_v8, %v107_v60  ;;  %v188_v15 = vadd.f32 %v152_v8, %v108_v61 }
  0x97   :  { %208 = vst [vmem:[%s533_s3 + $0x10] sm:$0xff] %v176_v57  ;;  %209 = vst [vmem:[%s533_s3 + $0x18] sm:$0xff] %v177_v58  ;;  %v189_v16 = vadd.f32 %v152_v8, %v109_v62  ;;  %v182_v17 = vadd.f32 %v147_v9, %v102_v1  ;;  %v183_v18 = vadd.f32 %v147_v9, %v103_v2 }
  0x98   :  { %v184_v19 = vadd.f32 %v147_v9, %v104_v3  ;;  %v185_v20 = vadd.f32 %v147_v9, %v105_v4  ;;  %218 = vst [vmem:[%s533_s3 + $0x60] sm:$0xff] %v186_v13  ;;  %219 = vst [vmem:[%s533_s3 + $0x68] sm:$0xff] %v187_v14  ;;  %v120_v55 = vmul.f32 %v335_v29, %v40_v43 }
  0x99   :  { %220 = vst [vmem:[%s533_s3 + $0x70] sm:$0xff] %v188_v15  ;;  %221 = vst [vmem:[%s533_s3 + $0x78] sm:$0xff] %v189_v16  ;;  %v162_v34 = vpop.permute.xlu1 %161  ;;  %v157_v35 = vpop.permute.xlu0 %156  ;;  %v121_v56 = vmul.f32 %v335_v29, %v41_v44 }
  0x9a   :  { %214 = vst [vmem:[%s533_s3 + $0x40] sm:$0xff] %v182_v17  ;;  %215 = vst [vmem:[%s533_s3 + $0x48] sm:$0xff] %v183_v18  ;;  %v194_v38 = vadd.f32 %v162_v34, %v114_v23  ;;  %v195_v39 = vadd.f32 %v162_v34, %v115_v24  ;;  %v196_v40 = vadd.f32 %v162_v34, %v116_v25 }
  0x9b   :  { %216 = vst [vmem:[%s533_s3 + $0x50] sm:$0xff] %v184_v19  ;;  %217 = vst [vmem:[%s533_s3 + $0x58] sm:$0xff] %v185_v20  ;;  %v197_v41 = vadd.f32 %v162_v34, %v117_v26  ;;  %v190_v45 = vadd.f32 %v157_v35, %v110_v30  ;;  %v191_v46 = vadd.f32 %v157_v35, %v111_v31 }
  0x9c   :  { %v192_v47 = vadd.f32 %v157_v35, %v112_v32  ;;  %v193_v48 = vadd.f32 %v157_v35, %v113_v33  ;;  %226 = vst [vmem:[%s533_s3 + $0xa0] sm:$0xff] %v194_v38  ;;  %227 = vst [vmem:[%s533_s3 + $0xa8] sm:$0xff] %v195_v39 }
  0x9d   :  { %228 = vst [vmem:[%s533_s3 + $0xb0] sm:$0xff] %v196_v40  ;;  %229 = vst [vmem:[%s533_s3 + $0xb8] sm:$0xff] %v197_v41  ;;  %v172_v53 = vpop.permute.xlu1 %171  ;;  %v167_v57 = vpop.permute.xlu0 %166 }
  0x9e   :  { %222 = vst [vmem:[%s533_s3 + $0x80] sm:$0xff] %v190_v45  ;;  %223 = vst [vmem:[%s533_s3 + $0x88] sm:$0xff] %v191_v46  ;;  %v202_v58 = vadd.f32 %v172_v53, %v122_v49  ;;  %v203_v59 = vadd.f32 %v172_v53, %v123_v50  ;;  %v204_v60 = vadd.f32 %v172_v53, %v124_v51 }
  0x9f   :  { %224 = vst [vmem:[%s533_s3 + $0x90] sm:$0xff] %v192_v47  ;;  %225 = vst [vmem:[%s533_s3 + $0x98] sm:$0xff] %v193_v48  ;;  %v205_v61 = vadd.f32 %v172_v53, %v125_v52  ;;  %v198_v62 = vadd.f32 %v167_v57, %v118_v54  ;;  %v199_v63 = vadd.f32 %v167_v57, %v119_v28 }
  0xa0   :  { %v200_v0 = vadd.f32 %v167_v57, %v120_v55  ;;  %v201_v1 = vadd.f32 %v167_v57, %v121_v56  ;;  %234 = vst [vmem:[%s533_s3 + $0xe0] sm:$0xff] %v202_v58  ;;  %235 = vst [vmem:[%s533_s3 + $0xe8] sm:$0xff] %v203_v59 }
  0xa1   :  { %236 = vst [vmem:[%s533_s3 + $0xf0] sm:$0xff] %v204_v60  ;;  %237 = vst [vmem:[%s533_s3 + $0xf8] sm:$0xff] %v205_v61 }
  0xa2   :  { %230 = vst [vmem:[%s533_s3 + $0xc0] sm:$0xff] %v198_v62  ;;  %231 = vst [vmem:[%s533_s3 + $0xc8] sm:$0xff] %v199_v63 }
  0xa3   :  { %232 = vst [vmem:[%s533_s3 + $0xd0] sm:$0xff] %v200_v0  ;;  %233 = vst [vmem:[%s533_s3 + $0xd8] sm:$0xff] %v201_v1 }

</bundles_post_ra>
